<compile_context>
chip_gen: v6e
topology: v6e:2x2x1
jax: 0.10.0
libtpu: 0.0.40
codegen_flags: <defaults>
</compile_context>

<pallas_src>
import functools

import jax
import jax.numpy as jnp
from jax.experimental import pallas as pl
from jax.experimental.pallas import tpu as pltpu

LN_EPS = 1e-5


def _layernorm_1pass(x, gamma, beta):
    """Single-pass LayerNorm (f32 only): one sum + one sum-of-squares reduce."""
    inv_d = 1.0 / x.shape[-1]
    s = jnp.sum(x, axis=-1, keepdims=True)
    ss = jnp.sum(x * x, axis=-1, keepdims=True)
    mu = s * inv_d
    var = ss * inv_d - mu * mu
    return (x - mu) * jax.lax.rsqrt(var + LN_EPS) * gamma + beta


def bond_ffn_kernel(
    x_ref,       # packed [bond | node | time], row-tiled over N  (T, Din)
    w1p_ref,     # stage-1 block weight (Din, P1)   P1 = round_up(2I+G, 128)
    wh_ref,      # inter_module layer-0 weight (I, I)
    w2p_ref,     # blockdiag(w2, gw2) (I+G, 2*out)
    vp_ref,      # packed small params (8, VD)
    out_ref,     # (T, out)
    hg_ref,      # VMEM scratch (T, I+G) for the stage-2 LHS
    *, inter_dim, gate_hidden, out_dim,
):
    x = x_ref[...]
    vp = vp_ref[...]
    b1, g1, be1 = vp[0:1, :inter_dim], vp[1:2, :inter_dim], vp[2:3, :inter_dim]
    gb1, gg, gbe = vp[3:4, :gate_hidden], vp[4:5, :gate_hidden], vp[5:6, :gate_hidden]
    b2p = vp[6:7, :2 * out_dim]

    # --- stage 1: one block-diagonal matmul covers bond_linear, node_linear
    #     and the gate's first Linear on concat([bond, node, time]) ---
    p = jnp.dot(x, w1p_ref[...], preferred_element_type=jnp.float32)      # (T, P1)

    inter = p[:, :inter_dim] * p[:, inter_dim:2 * inter_dim]

    # --- inter_module: Linear -> LayerNorm -> ReLU ---
    h = jnp.dot(inter, wh_ref[...], preferred_element_type=jnp.float32) + b1
    h = jnp.maximum(_layernorm_1pass(h, g1, be1), 0.0)

    # --- gate: (already matmul'ed) + bias -> LayerNorm -> ReLU ---
    gpre = p[:, 2 * inter_dim:2 * inter_dim + gate_hidden] + gb1
    g = jnp.maximum(_layernorm_1pass(gpre, gg, gbe), 0.0)

    # --- stage 2: one block-diagonal matmul covers both output Linears ---
    hg_ref[:, :inter_dim] = h
    hg_ref[:, inter_dim:] = g
    res = jnp.dot(hg_ref[...], w2p_ref[...], preferred_element_type=jnp.float32) + b2p

    out_ref[...] = (res[:, :out_dim] * jax.nn.sigmoid(res[:, out_dim:])).astype(out_ref.dtype)


def _round_up(n, m):
    return ((n + m - 1) // m) * m


@functools.partial(jax.jit, static_argnames=("tile",))
def bond_ffn(bond_in, node_in, time, params, *, tile=2048):
    N, bond_dim = bond_in.shape
    _, node_dim = node_in.shape
    inter_dim = params["wb"].shape[1]
    gh = params["gwb"].shape[1]
    out_dim = params["w2"].shape[1]
    d_in = bond_dim + node_dim + 1
    p1 = _round_up(2 * inter_dim + gh, 128)
    vd = max(inter_dim, gh, 2 * out_dim)

    # --- host-side packing: one (N, d_in) input slab + tiny packed weights ---
    # (Ideally the producer emits this packed layout directly.)
    x = jnp.concatenate(
        [bond_in.astype(jnp.float32), node_in.astype(jnp.float32),
         time.astype(jnp.float32)], axis=-1)

    w1p = jnp.zeros((d_in, p1), jnp.float32)
    w1p = w1p.at[:bond_dim, :inter_dim].set(params["wb"])
    w1p = w1p.at[bond_dim:bond_dim + node_dim, inter_dim:2 * inter_dim].set(params["wn"])
    w1p = w1p.at[:bond_dim, 2 * inter_dim:2 * inter_dim + gh].set(params["gwb"])
    w1p = w1p.at[bond_dim:bond_dim + node_dim,
                 2 * inter_dim:2 * inter_dim + gh].set(params["gwn"])
    w1p = w1p.at[bond_dim + node_dim:, 2 * inter_dim:2 * inter_dim + gh].set(params["gwt"])

    w2p = jnp.zeros((inter_dim + gh, 2 * out_dim), jnp.float32)
    w2p = w2p.at[:inter_dim, :out_dim].set(params["w2"])
    w2p = w2p.at[inter_dim:, out_dim:].set(params["gw2"])

    vp = jnp.zeros((8, vd), jnp.float32)
    vp = vp.at[0, :inter_dim].set(params["b1"][0])
    vp = vp.at[1, :inter_dim].set(params["g1"][0])
    vp = vp.at[2, :inter_dim].set(params["be1"][0])
    vp = vp.at[3, :gh].set(params["gb1"][0])
    vp = vp.at[4, :gh].set(params["gg"][0])
    vp = vp.at[5, :gh].set(params["gbe"][0])
    vp = vp.at[6, :out_dim].set(params["b2"][0])
    vp = vp.at[6, out_dim:2 * out_dim].set(params["gb2"][0])

    # --- row tiling: >=2 grid steps (v7x megacore), big tiles for large N,
    #     no whole-array padding (partial tail block handled by Pallas) ---
    tile = _round_up(max(8, tile), 8)
    half = _round_up(max(8, pl.cdiv(N, 2)), 8)
    tile = min(tile, half)
    grid = (pl.cdiv(N, tile),)

    slabs = 13  # x(2) + out(2) + hg scratch(1) + ~8 live intermediates (128-lane rows)
    vmem_limit = tile * 128 * 4 * slabs + (4 << 20)
    vmem_limit = max(16 << 20, min(vmem_limit, 48 << 20))

    row = lambda d: pl.BlockSpec((tile, d), lambda i: (i, 0))
    full = lambda r, c: pl.BlockSpec((r, c), lambda i: (0, 0))

    kernel = functools.partial(
        bond_ffn_kernel, inter_dim=inter_dim, gate_hidden=gh, out_dim=out_dim)

    return pl.pallas_call(
        kernel,
        out_shape=jax.ShapeDtypeStruct((N, out_dim), jnp.float32),
        grid_spec=pltpu.PrefetchScalarGridSpec(
            num_scalar_prefetch=0,
            grid=grid,
            in_specs=[
                row(d_in),
                full(d_in, p1),
                full(inter_dim, inter_dim),
                full(inter_dim + gh, 2 * out_dim),
                full(8, vd),
            ],
            out_specs=row(out_dim),
            scratch_shapes=[pltpu.VMEM((tile, inter_dim + gh), jnp.float32)],
        ),
        compiler_params=pltpu.CompilerParams(
            dimension_semantics=("parallel",),
            vmem_limit_bytes=vmem_limit,
        ),
    )(x, w1p, params["w1"], w2p, vp)


def _layernorm_ref(x, gamma, beta):
    mu = jnp.mean(x, axis=-1, keepdims=True)
    var = jnp.mean((x - mu) ** 2, axis=-1, keepdims=True)
    return (x - mu) * jax.lax.rsqrt(var + LN_EPS) * gamma + beta


def bond_ffn_reference(bond_in, node_in, time, p):
    """Pure-JAX reference mirroring the PyTorch forward."""
    bf = bond_in @ p["wb"]
    nf = node_in @ p["wn"]
    inter = bf * nf
    h = inter @ p["w1"] + p["b1"]
    h = _layernorm_ref(h, p["g1"], p["be1"])
    h = jnp.maximum(h, 0.0)
    inter = h @ p["w2"] + p["b2"]
    gate_in = jnp.concatenate([bond_in, node_in, time], axis=-1)
    wg1 = jnp.concatenate([p["gwb"], p["gwn"], p["gwt"]], axis=0)
    g = gate_in @ wg1 + p["gb1"]
    g = _layernorm_ref(g, p["gg"], p["gbe"])
    g = jnp.maximum(g, 0.0)
    gate = g @ p["gw2"] + p["gb2"]
    return inter * jax.nn.sigmoid(gate)


def init_params(key, bond_dim, node_dim, inter_dim, out_dim, gate_hidden=32):
    ks = jax.random.split(key, 12)
    n = lambda k, shp, s=0.1: (jax.random.normal(k, shp, jnp.float32) * s)
    return {
        # bond_linear / node_linear (bias=False), stored as [in, out]
        "wb": n(ks[0], (bond_dim, inter_dim)),
        "wn": n(ks[1], (node_dim, inter_dim)),
        # inter_module: Linear(inter,inter) -> LN(inter) -> ReLU -> Linear(inter,out)
        "w1": n(ks[2], (inter_dim, inter_dim)),
        "b1": n(ks[3], (1, inter_dim)),
        "g1": jnp.ones((1, inter_dim), jnp.float32),
        "be1": jnp.zeros((1, inter_dim), jnp.float32),
        "w2": n(ks[4], (inter_dim, out_dim)),
        "b2": n(ks[5], (1, out_dim)),
        # gate: Linear(bond+node+1, 32) -> LN(32) -> ReLU -> Linear(32, out)
        # first layer weight split into bond / node / time pieces
        "gwb": n(ks[6], (bond_dim, gate_hidden)),
        "gwn": n(ks[7], (node_dim, gate_hidden)),
        "gwt": n(ks[8], (1, gate_hidden)),
        "gb1": n(ks[9], (1, gate_hidden)),
        "gg": jnp.ones((1, gate_hidden), jnp.float32),
        "gbe": jnp.zeros((1, gate_hidden), jnp.float32),
        "gw2": n(ks[10], (gate_hidden, out_dim)),
        "gb2": n(ks[11], (1, out_dim)),
    }


if __name__ == "__main__":
    key = jax.random.PRNGKey(0)
    N = 256            # number of bonds (rows)
    bond_dim = 32
    node_dim = 32
    inter_dim = 32
    out_dim = bond_dim  # default: out_dim = bond_dim

    kp, kb, kn, kt = jax.random.split(key, 4)
    params = init_params(kp, bond_dim, node_dim, inter_dim, out_dim)
    bond_in = jax.random.normal(kb, (N, bond_dim), jnp.float32)
    node_in = jax.random.normal(kn, (N, node_dim), jnp.float32)
    time = jax.random.uniform(kt, (N, 1), jnp.float32)

    out = jax.block_until_ready(bond_ffn(bond_in, node_in, time, params))
    ref = bond_ffn_reference(bond_in, node_in, time, params)
    assert out.shape == (N, out_dim)
    assert jnp.allclose(out, ref, atol=1e-4, rtol=1e-4), \
        f"max abs err {jnp.max(jnp.abs(out - ref))}"

    # Ragged-N path (partial tail tile, no whole-array padding) exercised too.
    Nr = 200
    out_r = jax.block_until_ready(
        bond_ffn(bond_in[:Nr], node_in[:Nr], time[:Nr], params))
    ref_r = bond_ffn_reference(bond_in[:Nr], node_in[:Nr], time[:Nr], params)
    assert out_r.shape == (Nr, out_dim)
    assert jnp.allclose(out_r, ref_r, atol=1e-4, rtol=1e-4), \
        f"max abs err {jnp.max(jnp.abs(out_r - ref_r))}"

    print("KERNEL_OK")
</pallas_src>

<mosaic_0001>
module attributes {stable_mosaic.version = 11 : i64} {
  func.func @bond_ffn_kernel(%arg0: i32, %arg1: memref<128x65xf32, #tpu.memory_space<vmem>>, %arg2: memref<65x128xf32, #tpu.memory_space<vmem>>, %arg3: memref<32x32xf32, #tpu.memory_space<vmem>>, %arg4: memref<64x64xf32, #tpu.memory_space<vmem>>, %arg5: memref<8x64xf32, #tpu.memory_space<vmem>>, %arg6: memref<128x32xf32, #tpu.memory_space<vmem>>, %arg7: memref<128x64xf32, #tpu.memory_space<vmem>>) attributes {dimension_semantics = [#tpu.dimension_semantics<parallel>], iteration_bounds = array<i64: 2>, scalar_prefetch = 0 : i64, scratch_operands = 1 : i64, tpu.core_type = #tpu.core_type<tc>, window_params = [{transform_indices = @transform_0, window_bounds = array<i64: 128, 65>}, {pipeline_mode = #tpu.pipeline_mode<synchronous>, transform_indices = @transform_1, window_bounds = array<i64: 65, 128>}, {pipeline_mode = #tpu.pipeline_mode<synchronous>, transform_indices = @transform_2, window_bounds = array<i64: 32, 32>}, {pipeline_mode = #tpu.pipeline_mode<synchronous>, transform_indices = @transform_3, window_bounds = array<i64: 64, 64>}, {pipeline_mode = #tpu.pipeline_mode<synchronous>, transform_indices = @transform_4, window_bounds = array<i64: 8, 64>}, {transform_indices = @transform_5, window_bounds = array<i64: 128, 32>}]} {
    %c0 = arith.constant 0 : index
    %c0_0 = arith.constant 0 : index
    %0 = vector.load %arg1[%c0, %c0_0] : memref<128x65xf32, #tpu.memory_space<vmem>>, vector<128x65xf32>
    %c0_1 = arith.constant 0 : index
    %c0_2 = arith.constant 0 : index
    %1 = vector.load %arg5[%c0_1, %c0_2] : memref<8x64xf32, #tpu.memory_space<vmem>>, vector<8x64xf32>
    %2 = vector.extract_strided_slice %1 {offsets = [0, 0], sizes = [1, 32], strides = [1, 1]} : vector<8x64xf32> to vector<1x32xf32>
    %3 = vector.extract_strided_slice %1 {offsets = [1, 0], sizes = [1, 32], strides = [1, 1]} : vector<8x64xf32> to vector<1x32xf32>
    %4 = vector.extract_strided_slice %1 {offsets = [2, 0], sizes = [1, 32], strides = [1, 1]} : vector<8x64xf32> to vector<1x32xf32>
    %5 = vector.extract_strided_slice %1 {offsets = [3, 0], sizes = [1, 32], strides = [1, 1]} : vector<8x64xf32> to vector<1x32xf32>
    %6 = vector.extract_strided_slice %1 {offsets = [4, 0], sizes = [1, 32], strides = [1, 1]} : vector<8x64xf32> to vector<1x32xf32>
    %7 = vector.extract_strided_slice %1 {offsets = [5, 0], sizes = [1, 32], strides = [1, 1]} : vector<8x64xf32> to vector<1x32xf32>
    %8 = vector.extract_strided_slice %1 {offsets = [6, 0], sizes = [1, 64], strides = [1, 1]} : vector<8x64xf32> to vector<1x64xf32>
    %c0_3 = arith.constant 0 : index
    %c0_4 = arith.constant 0 : index
    %9 = vector.load %arg2[%c0_3, %c0_4] : memref<65x128xf32, #tpu.memory_space<vmem>>, vector<65x128xf32>
    %cst = arith.constant dense<0.000000e+00> : vector<128x128xf32>
    %10 = tpu.matmul %0, %9, %cst {dimension_numbers = #tpu.dot_dimension_numbers<[1], [0], [0], [1], [0, 0, 1, 1], [], []>} : vector<128x65xf32>, vector<65x128xf32>, vector<128x128xf32> -> vector<128x128xf32>
    %11 = vector.extract_strided_slice %10 {offsets = [0, 0], sizes = [128, 32], strides = [1, 1]} : vector<128x128xf32> to vector<128x32xf32>
    %12 = vector.extract_strided_slice %10 {offsets = [0, 32], sizes = [128, 32], strides = [1, 1]} : vector<128x128xf32> to vector<128x32xf32>
    %13 = arith.mulf %11, %12 : vector<128x32xf32>
    %c0_5 = arith.constant 0 : index
    %c0_6 = arith.constant 0 : index
    %14 = vector.load %arg3[%c0_5, %c0_6] : memref<32x32xf32, #tpu.memory_space<vmem>>, vector<32x32xf32>
    %cst_7 = arith.constant dense<0.000000e+00> : vector<128x32xf32>
    %15 = tpu.matmul %13, %14, %cst_7 {dimension_numbers = #tpu.dot_dimension_numbers<[1], [0], [0], [1], [0, 0, 1, 1], [], []>} : vector<128x32xf32>, vector<32x32xf32>, vector<128x32xf32> -> vector<128x32xf32>
    %16 = vector.broadcast %2 : vector<1x32xf32> to vector<128x32xf32>
    %17 = arith.addf %15, %16 : vector<128x32xf32>
    %cst_8 = arith.constant dense<0.000000e+00> : vector<128xf32>
    %18 = vector.multi_reduction <add>, %17, %cst_8 [1] : vector<128x32xf32> to vector<128xf32>
    %19 = vector.shape_cast %18 : vector<128xf32> to vector<128x1xf32>
    %20 = arith.mulf %17, %17 : vector<128x32xf32>
    %cst_9 = arith.constant dense<0.000000e+00> : vector<128xf32>
    %21 = vector.multi_reduction <add>, %20, %cst_9 [1] : vector<128x32xf32> to vector<128xf32>
    %22 = vector.shape_cast %21 : vector<128xf32> to vector<128x1xf32>
    %cst_10 = arith.constant 3.125000e-02 : f32
    %23 = vector.broadcast %cst_10 : f32 to vector<128x1xf32>
    %24 = arith.mulf %19, %23 : vector<128x1xf32>
    %cst_11 = arith.constant 3.125000e-02 : f32
    %25 = vector.broadcast %cst_11 : f32 to vector<128x1xf32>
    %26 = arith.mulf %22, %25 : vector<128x1xf32>
    %27 = arith.mulf %24, %24 : vector<128x1xf32>
    %28 = arith.subf %26, %27 : vector<128x1xf32>
    %29 = vector.broadcast %24 : vector<128x1xf32> to vector<128x32xf32>
    %30 = arith.subf %17, %29 : vector<128x32xf32>
    %cst_12 = arith.constant 9.99999974E-6 : f32
    %31 = vector.broadcast %cst_12 : f32 to vector<128x1xf32>
    %32 = arith.addf %28, %31 : vector<128x1xf32>
    %33 = math.rsqrt %32 : vector<128x1xf32>
    %34 = vector.broadcast %33 : vector<128x1xf32> to vector<128x32xf32>
    %35 = arith.mulf %30, %34 : vector<128x32xf32>
    %36 = vector.broadcast %3 : vector<1x32xf32> to vector<128x32xf32>
    %37 = arith.mulf %35, %36 : vector<128x32xf32>
    %38 = vector.broadcast %4 : vector<1x32xf32> to vector<128x32xf32>
    %39 = arith.addf %37, %38 : vector<128x32xf32>
    %cst_13 = arith.constant 0.000000e+00 : f32
    %40 = vector.broadcast %cst_13 : f32 to vector<128x32xf32>
    %41 = arith.maximumf %39, %40 : vector<128x32xf32>
    %42 = vector.extract_strided_slice %10 {offsets = [0, 64], sizes = [128, 32], strides = [1, 1]} : vector<128x128xf32> to vector<128x32xf32>
    %43 = vector.broadcast %5 : vector<1x32xf32> to vector<128x32xf32>
    %44 = arith.addf %42, %43 : vector<128x32xf32>
    %cst_14 = arith.constant dense<0.000000e+00> : vector<128xf32>
    %45 = vector.multi_reduction <add>, %44, %cst_14 [1] : vector<128x32xf32> to vector<128xf32>
    %46 = vector.shape_cast %45 : vector<128xf32> to vector<128x1xf32>
    %47 = arith.mulf %44, %44 : vector<128x32xf32>
    %cst_15 = arith.constant dense<0.000000e+00> : vector<128xf32>
    %48 = vector.multi_reduction <add>, %47, %cst_15 [1] : vector<128x32xf32> to vector<128xf32>
    %49 = vector.shape_cast %48 : vector<128xf32> to vector<128x1xf32>
    %cst_16 = arith.constant 3.125000e-02 : f32
    %50 = vector.broadcast %cst_16 : f32 to vector<128x1xf32>
    %51 = arith.mulf %46, %50 : vector<128x1xf32>
    %cst_17 = arith.constant 3.125000e-02 : f32
    %52 = vector.broadcast %cst_17 : f32 to vector<128x1xf32>
    %53 = arith.mulf %49, %52 : vector<128x1xf32>
    %54 = arith.mulf %51, %51 : vector<128x1xf32>
    %55 = arith.subf %53, %54 : vector<128x1xf32>
    %56 = vector.broadcast %51 : vector<128x1xf32> to vector<128x32xf32>
    %57 = arith.subf %44, %56 : vector<128x32xf32>
    %cst_18 = arith.constant 9.99999974E-6 : f32
    %58 = vector.broadcast %cst_18 : f32 to vector<128x1xf32>
    %59 = arith.addf %55, %58 : vector<128x1xf32>
    %60 = math.rsqrt %59 : vector<128x1xf32>
    %61 = vector.broadcast %60 : vector<128x1xf32> to vector<128x32xf32>
    %62 = arith.mulf %57, %61 : vector<128x32xf32>
    %63 = vector.broadcast %6 : vector<1x32xf32> to vector<128x32xf32>
    %64 = arith.mulf %62, %63 : vector<128x32xf32>
    %65 = vector.broadcast %7 : vector<1x32xf32> to vector<128x32xf32>
    %66 = arith.addf %64, %65 : vector<128x32xf32>
    %cst_19 = arith.constant 0.000000e+00 : f32
    %67 = vector.broadcast %cst_19 : f32 to vector<128x32xf32>
    %68 = arith.maximumf %66, %67 : vector<128x32xf32>
    %c0_20 = arith.constant 0 : index
    %c0_21 = arith.constant 0 : index
    %69 = vector.load %arg7[%c0_20, %c0_21] : memref<128x64xf32, #tpu.memory_space<vmem>>, vector<128x32xf32>
    tpu.vector_store %arg7[%c0_20, %c0_21], %41 {strides = array<i32>} : memref<128x64xf32, #tpu.memory_space<vmem>>, vector<128x32xf32>,
    %c0_22 = arith.constant 0 : index
    %c32 = arith.constant 32 : index
    %70 = vector.load %arg7[%c0_22, %c32] : memref<128x64xf32, #tpu.memory_space<vmem>>, vector<128x32xf32>
    tpu.vector_store %arg7[%c0_22, %c32], %68 {strides = array<i32>} : memref<128x64xf32, #tpu.memory_space<vmem>>, vector<128x32xf32>,
    %c0_23 = arith.constant 0 : index
    %c0_24 = arith.constant 0 : index
    %71 = vector.load %arg7[%c0_23, %c0_24] : memref<128x64xf32, #tpu.memory_space<vmem>>, vector<128x64xf32>
    %c0_25 = arith.constant 0 : index
    %c0_26 = arith.constant 0 : index
    %72 = vector.load %arg4[%c0_25, %c0_26] : memref<64x64xf32, #tpu.memory_space<vmem>>, vector<64x64xf32>
    %cst_27 = arith.constant dense<0.000000e+00> : vector<128x64xf32>
    %73 = tpu.matmul %71, %72, %cst_27 {dimension_numbers = #tpu.dot_dimension_numbers<[1], [0], [0], [1], [0, 0, 1, 1], [], []>} : vector<128x64xf32>, vector<64x64xf32>, vector<128x64xf32> -> vector<128x64xf32>
    %74 = vector.broadcast %8 : vector<1x64xf32> to vector<128x64xf32>
    %75 = arith.addf %73, %74 : vector<128x64xf32>
    %76 = vector.extract_strided_slice %75 {offsets = [0, 0], sizes = [128, 32], strides = [1, 1]} : vector<128x64xf32> to vector<128x32xf32>
    %77 = vector.extract_strided_slice %75 {offsets = [0, 32], sizes = [128, 32], strides = [1, 1]} : vector<128x64xf32> to vector<128x32xf32>
    %78 = arith.negf %77 : vector<128x32xf32>
    %79 = math.exp %78 : vector<128x32xf32>
    %cst_28 = arith.constant 1.000000e+00 : f32
    %80 = vector.broadcast %cst_28 : f32 to vector<128x32xf32>
    %81 = arith.addf %80, %79 : vector<128x32xf32>
    %82 = arith.divf %80, %81 : vector<128x32xf32>
    %83 = arith.mulf %76, %82 : vector<128x32xf32>
    %c0_29 = arith.constant 0 : index
    %c0_30 = arith.constant 0 : index
    %84 = vector.load %arg6[%c0_29, %c0_30] : memref<128x32xf32, #tpu.memory_space<vmem>>, vector<128x32xf32>
    tpu.vector_store %arg6[%c0_29, %c0_30], %83 {strides = array<i32>} : memref<128x32xf32, #tpu.memory_space<vmem>>, vector<128x32xf32>,
    return
  }
  func.func @transform_0(%arg0: i32) -> (i32, i32) {
    %c0_i32 = arith.constant 0 : i32
    %c0_i32_0 = arith.constant 0 : i32
    return %arg0, %c0_i32 : i32, i32
  }
  func.func @transform_1(%arg0: i32) -> (i32, i32) {
    %c0_i32 = arith.constant 0 : i32
    %c0_i32_0 = arith.constant 0 : i32
    %c0_i32_1 = arith.constant 0 : i32
    return %c0_i32, %c0_i32_0 : i32, i32
  }
  func.func @transform_2(%arg0: i32) -> (i32, i32) {
    %c0_i32 = arith.constant 0 : i32
    %c0_i32_0 = arith.constant 0 : i32
    %c0_i32_1 = arith.constant 0 : i32
    return %c0_i32, %c0_i32_0 : i32, i32
  }
  func.func @transform_3(%arg0: i32) -> (i32, i32) {
    %c0_i32 = arith.constant 0 : i32
    %c0_i32_0 = arith.constant 0 : i32
    %c0_i32_1 = arith.constant 0 : i32
    return %c0_i32, %c0_i32_0 : i32, i32
  }
  func.func @transform_4(%arg0: i32) -> (i32, i32) {
    %c0_i32 = arith.constant 0 : i32
    %c0_i32_0 = arith.constant 0 : i32
    %c0_i32_1 = arith.constant 0 : i32
    return %c0_i32, %c0_i32_0 : i32, i32
  }
  func.func @transform_5(%arg0: i32) -> (i32, i32) {
    %c0_i32 = arith.constant 0 : i32
    %c0_i32_0 = arith.constant 0 : i32
    return %arg0, %c0_i32 : i32, i32
  }
}

</mosaic_0001>

<bundles_post_ra>
// kernel: bond_ffn.1
= control target key start
LH: loop header
LB: loop body
LE: loop exit
PB: predicated region body
PF: predicated region fallthrough
CT: control target
= control target key end

     0   :  { %s2499_s18 = smov 0   ;;  %s3499_s0 = inlined_call_operand.vmem [shape: f32[256,65], index: 0, kind: input, shape index: {}]   ;;  %s3500_s1 = inlined_call_operand.vmem [shape: f32[65,128], index: 1, kind: input, shape index: {}]   ;;  %s3501_s2 = inlined_call_operand.vmem [shape: f32[32,32], index: 2, kind: input, shape index: {}]   ;;  %s3502_s3 = inlined_call_operand.vmem [shape: f32[64,64], index: 3, kind: input, shape index: {}]   ;;  %s3503_s4 = inlined_call_operand.vmem [shape: f32[8,64], index: 4, kind: input, shape index: {}]   ;;  %s3504_s5 = inlined_call_operand.vmem [shape: f32[256,32], index: 5, kind: output, shape index: {}]  }
   0x1 LB: > { %s2053_s19 = sadd.s32 4294967295, %s2465_s18   ;;  %p2057_p0 = scmp.ge.s32.totalorder %s2465_s18, 1  ;;  %s2465_s18 = sphi %s2499_s18, %s15_s18  }
   0x2   : > { %p188_p1 = scmp.lt.s32.totalorder %s2465_s18, 3 }
   0x4   : > { %p189_p2 = pnand %p2057_p0, %p188_p1 }
   0x5   : > { %s2058_s24 = sshll.u32 (!%p189_p2), %s2053_s19, 4  ;;  %s2467_s14 = smov (!%p189_p2), 64  }
   0x6   : > { %192 = sbr.rel (%p189_p2) target bundleno = 1197 (0x4ad), region = 40  ;;  %p217_p3 = scmp.lt.s32.totalorder (!%p189_p2), %s2058_s24, 31 }
   0x7   : > { %s2468_s7 = smov (!%p189_p2), 96  }
   0xb   : > { %v253_v0 = vld [vmem:[%s3500_s1 + $0x40] sm:$0x1]  ;;  %vm303_vm0 = vcmask 1040384   ;;  %v252_v1 = vld [vmem:[%s3500_s1 + $0x38] sm:$0xff]  ;;  %v536_v2 = vlaneseq  ;;  %v251_v3 = vld [vmem:[%s3500_s1 + $0x30] sm:$0xff]  ;;  %s3506_s24 = smov (!%p217_p3, %s2058_s24), 31 }
   0xc   : > { %2198 = vmatprep.subr.msk.mxu0 %vm303_vm0, %v253_v0  ;;  %v2523_v5 = vld [vmem:[%s3503_s4] sm:$0xff]  ;;  %v250_v6 = vld [vmem:[%s3500_s1 + $0x28] sm:$0xff]  ;;  %s2059_s6 = sshll.u32 %s3506_s24, 3  ;;  %vm254_vm1 = vcmask 531456   ;;  %v248_v11 = vld [vmem:[%s3500_s1 + $0x18] sm:$0xff]  ;;  %vm540_vm2 = vcmask 261120  }
   0xd   : > { %2199 = vmatpush3.msk.msra.mxu0 %vm303_vm0, %v253_v0  ;;  %v2516_v4 = vshrl.u32 %v536_v2, 7  ;;  %v249_v8 = vld [vmem:[%s3500_s1 + $0x20] sm:$0xff]  ;;  %s2538_s11 = scalar_lea.vmem %s3499_s0, %s2059_s6  ;;  %v247_v12 = vld [vmem:[%s3500_s1 + $0x10] sm:$0xff]  ;;  %v246_v13 = vld [vmem:[%s3500_s1 + $0x8] sm:$0xff]  ;;  %vm1566_vm3 = vcmask 523520   ;;  %vm1611_vm4 = vcmask 523264   ;;  %s3446_s30 = scalar_lea.vmem %s3504_s5, %s2059_s6 }
   0xe   : > { %2200 = vmatprep.subr.mxu0 %v252_v1  ;;  %v228_v10 = vld [vmem:[%s2538_s11] sm:$0xff]  ;;  %v229_v15 = vld [vmem:[%s2538_s11 + $0x8] sm:$0xff]  ;;  %v230_v16 = vld [vmem:[%s2538_s11 + $0x10] sm:$0xff] }
   0xf   : > { %2201 = vmatpush3.msra.mxu0 %v252_v1  ;;  %v1032_v7 = vsub.s32 3, %v2516_v4  ;;  %2216 = vmatprep.mubr.msk.f32.mxu0 %vm254_vm1, %v228_v10  ;;  %v245_v14 = vld [vmem:[%s3500_s1] sm:$0xff]  ;;  %v231_v17 = vld [vmem:[%s2538_s11 + $0x18] sm:$0xff]  ;;  %v233_v19 = vld [vmem:[%s2538_s11 + $0x28] sm:$0xff] }
  0x10   : > { %2202 = vmatprep.subr.mxu0 %v251_v3  ;;  %v232_v18 = vld [vmem:[%s2538_s11 + $0x20] sm:$0xff]  ;;  %v234_v20 = vld [vmem:[%s2538_s11 + $0x30] sm:$0xff]  ;;  %v235_v21 = vld [vmem:[%s2538_s11 + $0x38] sm:$0xff] }
  0x11   : > { %2203 = vmatpush3.msra.mxu0 %v251_v3  ;;  %v1033_v9 = vrot.slane %v2523_v5, %v1032_v7  ;;  %v236_v22 = vld [vmem:[%s2538_s11 + $0x40] sm:$0xff]  ;;  %v237_v23 = vld [vmem:[%s2538_s11 + $0x48] sm:$0xff]  ;;  %v238_v24 = vld [vmem:[%s2538_s11 + $0x50] sm:$0xff] }
  0x12   : > { %2204 = vmatprep.subr.mxu0 %v250_v6  ;;  %v239_v25 = vld [vmem:[%s2538_s11 + $0x58] sm:$0xff]  ;;  %v240_v26 = vld [vmem:[%s2538_s11 + $0x60] sm:$0xff]  ;;  %v241_v27 = vld [vmem:[%s2538_s11 + $0x68] sm:$0xff] }
  0x13   : > { %2205 = vmatpush3.msra.mxu0 %v250_v6  ;;  %1035 = vrot.lane.b32.xlu0 %v1033_v9, %s2467_s14  ;;  %v242_v28 = vld [vmem:[%s2538_s11 + $0x70] sm:$0xff]  ;;  %v243_v29 = vld [vmem:[%s2538_s11 + $0x78] sm:$0xff]  ;;  %v533_v32 = vld [vmem:[%s3501_s2 + $0x8] sm:$0xff] }
  0x14   : > { %2206 = vmatprep.subr.mxu0 %v249_v8  ;;  %v535_v30 = vld [vmem:[%s3501_s2 + $0x18] sm:$0xff]  ;;  %v534_v31 = vld [vmem:[%s3501_s2 + $0x10] sm:$0xff]  ;;  %v532_v33 = vld [vmem:[%s3501_s2] sm:$0xff] }
  0x15   : > { %2207 = vmatpush3.msra.mxu0 %v249_v8  ;;  %2312 = vmatprep.subr.mxu1 %v535_v30 }
  0x16   : > { %2208 = vmatprep.subr.mxu0 %v248_v11  ;;  %2316 = vmatpush3.msra.mxu1 %v535_v30 }
  0x17   : > { %2209 = vmatpush3.msra.mxu0 %v248_v11  ;;  %2313 = vmatprep.subr.mxu1 %v534_v31 }
  0x18   : > { %2210 = vmatprep.subr.mxu0 %v247_v12  ;;  %2317 = vmatpush3.msra.mxu1 %v534_v31 }
  0x19   : > { %2211 = vmatpush3.msra.mxu0 %v247_v12  ;;  %2314 = vmatprep.subr.mxu1 %v533_v32 }
  0x1a   : > { %2212 = vmatprep.subr.mxu0 %v246_v13  ;;  %2318 = vmatpush3.msra.mxu1 %v533_v32 }
  0x1b   : > { %2213 = vmatpush3.msra.mxu0 %v246_v13  ;;  %2315 = vmatprep.subr.mxu1 %v532_v33 }
  0x1c   : > { %2214 = vmatprep.subr.mxu0 %v245_v14  ;;  %2319 = vmatpush3.msra.mxu1 %v532_v33 }
  0x1d   : > { %2215 = vmatpush3.msra.mxu0 %v245_v14  ;;  %v1448_v14 = vsub.s32 5, %v2516_v4 }
  0x1e   : > { %2217 = vmatmul.mubr.msk.f32.vlgmr.msra.gmra.mxu0 %vm254_vm1, %v229_v15  ;;  %2240 = vmatprep.subr.mxu0 %v535_v30  ;;  %v1424_v15 = vsub.s32 4, %v2516_v4 }
  0x1f   : > { %2219 = vmatprep.mubr.msk.f32.mxu0 %vm254_vm1, %v230_v16  ;;  %2241 = vmatpush3.msra.mxu0 %v535_v30 }
  0x20   : > { %2242 = vmatprep.subr.mxu0 %v534_v31 }
  0x21   : > { %2243 = vmatpush3.msra.mxu0 %v534_v31 }
  0x22   : > { %2220 = vmatmul.mubr.msk.f32.gmra.mxu0 %vm254_vm1, %v231_v17  ;;  %2244 = vmatprep.subr.mxu0 %v533_v32 }
  0x23   : > { %2222 = vmatprep.mubr.msk.f32.mxu0 %vm254_vm1, %v232_v18  ;;  %2245 = vmatpush3.msra.mxu0 %v533_v32  ;;  %v1449_v18 = vrot.slane %v2523_v5, %v1448_v14 }
  0x24   : > { %2246 = vmatprep.subr.mxu0 %v532_v33 }
  0x25   : > { %2247 = vmatpush3.msra.mxu0 %v532_v33 }
  0x26   : > { %2223 = vmatmul.mubr.msk.f32.gmra.mxu0 %vm254_vm1, %v233_v19  ;;  %v1425_v19 = vrot.slane %v2523_v5, %v1424_v15 }
  0x27   : > { %2225 = vmatprep.mubr.msk.f32.mxu0 %vm254_vm1, %v234_v20 }
  0x2a   : > { %2226 = vmatmul.mubr.msk.f32.gmra.mxu0 %vm254_vm1, %v235_v21 }
  0x2b   : > { %2228 = vmatprep.mubr.msk.f32.mxu0 %vm254_vm1, %v236_v22 }
  0x2e   : > { %2229 = vmatmul.mubr.msk.f32.gmra.mxu0 %vm254_vm1, %v237_v23 }
  0x2f   : > { %2231 = vmatprep.mubr.msk.f32.mxu0 %vm254_vm1, %v238_v24 }
  0x32   : > { %2232 = vmatmul.mubr.msk.f32.gmra.mxu0 %vm254_vm1, %v239_v25 }
  0x33   : > { %2234 = vmatprep.mubr.msk.f32.mxu0 %vm254_vm1, %v240_v26 }
  0x36   : > { %2235 = vmatmul.mubr.msk.f32.gmra.mxu0 %vm254_vm1, %v241_v27 }
  0x37   : > { %2237 = vmatprep.mubr.msk.f32.mxu0 %vm254_vm1, %v242_v28 }
  0x3a   : > { %2238 = vmatmul.mubr.msk.f32.gmra.mxu0 %vm254_vm1, %v243_v29 }
  0x85   : > { %v2604_v36 = vpop.permute.xlu0 %1035 }
  0xde   : > { %v2598_v34 = vpop.f32.mrf.mxu0 }
  0xdf   : > { %470 = vrot.lane.b32.xlu0 %v2598_v34, %s2468_s7  ;;  %v2616_v39 = vadd.f32 %v2598_v34, %v2604_v36 }
  0xe0   : > { %v2602_v35 = vpop.f32.mrf.mxu0 }
  0xe1   : > { %v2620_v40 = vadd.f32 %v2604_v36, %v2602_v35  ;;  %v1167_v43 = vmul.f32 %v2616_v39, %v2616_v39 }
  0xe2   : > { %v2606_v37 = vpop.f32.mrf.mxu0 }
  0xe3   : > { %468 = vrot.lane.b32.xlu0 %v2602_v35, %s2468_s7  ;;  %474 = vrot.lane.b32.xlu1 %v2606_v37, %s2468_s7  ;;  %v2641_v46 = vadd.f32 %v2606_v37, %v2604_v36  ;;  %v1166_v47 = vmul.f32 %v2620_v40, %v2620_v40 }
  0xe4   : > { %v2612_v38 = vpop.f32.mrf.mxu0 }
  0xe5   : > { %v2660_v51 = vadd.f32 %v2604_v36, %v2612_v38  ;;  %v1169_v58 = vmul.f32 %v2641_v46, %v2641_v46 }
  0xe6   : > { %v2622_v41 = vpop.f32.mrf.mxu0 }
  0xe7   : > { %1072 = vrot.lane.b32.xlu0 %v2616_v39, %s2467_s14  ;;  %1070 = vrot.lane.b32.xlu1 %v2620_v40, %s2467_s14  ;;  %v1168_v53 = vmul.f32 %v2660_v51, %v2660_v51  ;;  %v2700_v59 = vadd.f32 %v2622_v41, %v2604_v36 }
  0xe8   : > { %v2628_v42 = vpop.f32.mrf.mxu0 }
  0xe9   : > { %v2708_v60 = vadd.f32 %v2604_v36, %v2628_v42  ;;  %v1171_v61 = vmul.f32 %v2700_v59, %v2700_v59 }
  0xea   : > { %v2632_v44 = vpop.f32.mrf.mxu0 }
  0xeb   : > { %1200 = vrot.lane.b32.xlu0 %v1167_v43, %s2467_s14  ;;  %472 = vrot.lane.b32.xlu1 %v2612_v38, %s2468_s7  ;;  %v2717_v62 = vadd.f32 %v2632_v44, %v2604_v36  ;;  %v1170_v63 = vmul.f32 %v2708_v60, %v2708_v60 }
  0xec   : > { %v2637_v45 = vpop.f32.mrf.mxu0 }
  0xed   : > { %v2726_v0 = vadd.f32 %v2604_v36, %v2637_v45  ;;  %v1173_v1 = vmul.f32 %v2717_v62, %v2717_v62 }
  0xee   : > { %v2645_v48 = vpop.f32.mrf.mxu0 }
  0xef   : > { %1076 = vrot.lane.b32.xlu0 %v2641_v46, %s2467_s14  ;;  %1198 = vrot.lane.b32.xlu1 %v1166_v47, %s2467_s14  ;;  %v2735_v2 = vadd.f32 %v2645_v48, %v2604_v36  ;;  %v1172_v3 = vmul.f32 %v2726_v0, %v2726_v0 }
  0xf0   : > { %v2650_v49 = vpop.f32.mrf.mxu0 }
  0xf1   : > { %v2744_v6 = vadd.f32 %v2604_v36, %v2650_v49  ;;  %v1175_v7 = vmul.f32 %v2735_v2, %v2735_v2 }
  0xf2   : > { %v2652_v50 = vpop.f32.mrf.mxu0 }
  0xf3   : > { %478 = vrot.lane.b32.xlu1 %v2622_v41, %s2468_s7  ;;  %476 = vrot.lane.b32.xlu0 %v2628_v42, %s2468_s7  ;;  %v2753_v8 = vadd.f32 %v2652_v50, %v2604_v36  ;;  %v1174_v9 = vmul.f32 %v2744_v6, %v2744_v6 }
  0xf4   : > { %v2662_v52 = vpop.f32.mrf.mxu0 }
  0xf5   : > { %v2762_v10 = vadd.f32 %v2604_v36, %v2662_v52  ;;  %v1177_v11 = vmul.f32 %v2753_v8, %v2753_v8 }
  0xf6   : > { %v2670_v54 = vpop.f32.mrf.mxu0 }
  0xf7   : > { %1074 = vrot.lane.b32.xlu1 %v2660_v51, %s2467_s14  ;;  %480 = vrot.lane.b32.xlu0 %v2637_v45, %s2468_s7  ;;  %v2771_v12 = vadd.f32 %v2670_v54, %v2604_v36  ;;  %v1176_v13 = vmul.f32 %v2762_v10, %v2762_v10 }
  0xf8   : > { %v2675_v55 = vpop.f32.mrf.mxu0 }
  0xf9   : > { %v2782_v16 = vadd.f32 %v2604_v36, %v2675_v55  ;;  %v1179_v17 = vmul.f32 %v2771_v12, %v2771_v12 }
  0xfa   : > { %v2681_v56 = vpop.f32.mrf.mxu0 }
  0xfb   : > { %1202 = vrot.lane.b32.xlu1 %v1168_v53, %s2467_s14  ;;  %484 = vrot.lane.b32.xlu0 %v2650_v49, %s2468_s7  ;;  %v2795_v20 = vadd.f32 %v2681_v56, %v2604_v36  ;;  %v1178_v21 = vmul.f32 %v2782_v16, %v2782_v16 }
  0xfc   : > { %v2687_v57 = vpop.f32.mrf.mxu0 }
  0xfd   : > { %v2804_v22 = vadd.f32 %v2604_v36, %v2687_v57  ;;  %v1181_v23 = vmul.f32 %v2795_v20, %v2795_v20 }
  0xff   : > { %482 = vrot.lane.b32.xlu1 %v2632_v44, %s2468_s7  ;;  %488 = vrot.lane.b32.xlu0 %v2662_v52, %s2468_s7  ;;  %v1180_v24 = vmul.f32 %v2804_v22, %v2804_v22 }
 0x103   : > { %486 = vrot.lane.b32.xlu1 %v2645_v48, %s2468_s7  ;;  %492 = vrot.lane.b32.xlu0 %v2675_v55, %s2468_s7 }
 0x107   : > { %490 = vrot.lane.b32.xlu1 %v2652_v50, %s2468_s7  ;;  %496 = vrot.lane.b32.xlu0 %v2687_v57, %s2468_s7 }
 0x10b   : > { %494 = vrot.lane.b32.xlu1 %v2670_v54, %s2468_s7  ;;  %1204 = vrot.lane.b32.xlu0 %v1169_v58, %s2467_s14 }
 0x10f   : > { %498 = vrot.lane.b32.xlu1 %v2681_v56, %s2468_s7  ;;  %1080 = vrot.lane.b32.xlu0 %v2700_v59, %s2467_s14 }
 0x113   : > { %1078 = vrot.lane.b32.xlu1 %v2708_v60, %s2467_s14  ;;  %1208 = vrot.lane.b32.xlu0 %v1171_v61, %s2467_s14 }
 0x117   : > { %1206 = vrot.lane.b32.xlu1 %v1170_v63, %s2467_s14  ;;  %1084 = vrot.lane.b32.xlu0 %v2717_v62, %s2467_s14 }
 0x11b   : > { %1082 = vrot.lane.b32.xlu1 %v2726_v0, %s2467_s14  ;;  %1212 = vrot.lane.b32.xlu0 %v1173_v1, %s2467_s14 }
 0x11f   : > { %1210 = vrot.lane.b32.xlu1 %v1172_v3, %s2467_s14  ;;  %1088 = vrot.lane.b32.xlu0 %v2735_v2, %s2467_s14 }
 0x123   : > { %1086 = vrot.lane.b32.xlu1 %v2744_v6, %s2467_s14  ;;  %1216 = vrot.lane.b32.xlu0 %v1175_v7, %s2467_s14 }
 0x127   : > { %1214 = vrot.lane.b32.xlu1 %v1174_v9, %s2467_s14  ;;  %1092 = vrot.lane.b32.xlu0 %v2753_v8, %s2467_s14 }
 0x12b   : > { %1090 = vrot.lane.b32.xlu1 %v2762_v10, %s2467_s14  ;;  %1220 = vrot.lane.b32.xlu0 %v1177_v11, %s2467_s14 }
 0x12f   : > { %1218 = vrot.lane.b32.xlu1 %v1176_v13, %s2467_s14  ;;  %1096 = vrot.lane.b32.xlu0 %v2771_v12, %s2467_s14 }
 0x133   : > { %1094 = vrot.lane.b32.xlu1 %v2782_v16, %s2467_s14  ;;  %1224 = vrot.lane.b32.xlu0 %v1179_v17, %s2467_s14 }
 0x137   : > { %1451 = vrot.lane.b32.xlu1 %v1449_v18, %s2467_s14  ;;  %1427 = vrot.lane.b32.xlu0 %v1425_v19, %s2467_s14 }
 0x13b   : > { %1222 = vrot.lane.b32.xlu1 %v1178_v21, %s2467_s14  ;;  %1100 = vrot.lane.b32.xlu0 %v2795_v20, %s2467_s14 }
 0x13f   : > { %1228 = vrot.lane.b32.xlu0 %v1181_v23, %s2467_s14  ;;  %1098 = vrot.lane.b32.xlu1 %v2804_v22, %s2467_s14 }
 0x143   : > { %1226 = vrot.lane.b32.xlu1 %v1180_v24, %s2467_s14 }
 0x151   : > { %v471_v25 = vpop.permute.xlu0 %470 }
 0x152   : > { %v517_v29 = vmul.f32 %v2598_v34, %v471_v25 }
 0x155   : > { %v469_v26 = vpop.permute.xlu0 %468  ;;  %v475_v27 = vpop.permute.xlu1 %474 }
 0x156   : > { %v516_v28 = vmul.f32 %v469_v26, %v2602_v35  ;;  %v519_v47 = vmul.f32 %v2606_v37, %v475_v27 }
 0x158   : > { %2248 = vmatprep.mubr.msk.f32.mxu0 %vm540_vm2, %v516_v28 }
 0x159   : > { %2249 = vmatmul.mubr.msk.f32.vlgmr.msra.gmra.mxu0 %vm540_vm2, %v517_v29  ;;  %v1073_v30 = vpop.permute.xlu0 %1072  ;;  %v1071_v31 = vpop.permute.xlu1 %1070 }
 0x15a   : > { %v1121_v36 = vsel %vm540_vm2, %v1073_v30, 0.0  ;;  %v1118_v1 = vsel %vm540_vm2, %v1071_v31, 0.0 }
 0x15d   : > { %v1201_v32 = vpop.permute.xlu0 %1200  ;;  %v473_v33 = vpop.permute.xlu1 %472 }
 0x15e   : > { %v518_v43 = vmul.f32 %v473_v33, %v2612_v38  ;;  %1122 = vadd.xlane.f32.xlu0 %v1121_v36  ;;  %v1249_v11 = vsel %vm540_vm2, %v1201_v32, 0.0 }
 0x160   : > { %2251 = vmatprep.mubr.msk.f32.mxu0 %vm540_vm2, %v518_v43 }
 0x161   : > { %v1077_v35 = vpop.permute.xlu0 %1076  ;;  %2252 = vmatmul.mubr.msk.f32.gmra.mxu0 %vm540_vm2, %v519_v47  ;;  %v1199_v34 = vpop.permute.xlu1 %1198 }
 0x162   : > { %v1246_v53 = vsel %vm540_vm2, %v1199_v34, 0.0  ;;  %v1127_v14 = vsel %vm540_vm2, %v1077_v35, 0.0 }
 0x163   : > { %1247 = vadd.xlane.f32.xlu0 %v1246_v53 }
 0x165   : > { %v479_v58 = vpop.permute.xlu1 %478  ;;  %v477_v61 = vpop.permute.xlu0 %476 }
 0x166   : > { %v521_v63 = vmul.f32 %v2622_v41, %v479_v58  ;;  %v520_v38 = vmul.f32 %v477_v61, %v2628_v42 }
 0x167   : > { %1119 = vadd.xlane.f32.xlu1 %v1118_v1 }
 0x168   : > { %2254 = vmatprep.mubr.msk.f32.mxu1 %vm540_vm2, %v520_v38 }
 0x169   : > { %v1075_v37 = vpop.permute.xlu1 %1074  ;;  %2255 = vmatmul.mubr.msk.f32.vlgmr.msra.gmra.mxu1 %vm540_vm2, %v521_v63  ;;  %v481_v3 = vpop.permute.xlu0 %480 }
 0x16a   : > { %v522_v7 = vmul.f32 %v481_v3, %v2637_v45  ;;  %v1124_v9 = vsel %vm540_vm2, %v1075_v37, 0.0 }
 0x16b   : > { %1125 = vadd.xlane.f32.xlu0 %v1124_v9  ;;  %1250 = vadd.xlane.f32.xlu1 %v1249_v11 }
 0x16c   : > { %2257 = vmatprep.mubr.msk.f32.mxu1 %vm540_vm2, %v522_v7 }
 0x16d   : > { %v1203_v41 = vpop.permute.xlu1 %1202  ;;  %v485_v13 = vpop.permute.xlu0 %484 }
 0x16e   : > { %v1252_v42 = vsel %vm540_vm2, %v1203_v41, 0.0  ;;  %v524_v18 = vmul.f32 %v485_v13, %v2650_v49 }
 0x16f   : > { %1253 = vadd.xlane.f32.xlu0 %v1252_v42  ;;  %1128 = vadd.xlane.f32.xlu1 %v1127_v14 }
 0x171   : > { %v483_v15 = vpop.permute.xlu1 %482  ;;  %v489_v17 = vpop.permute.xlu0 %488 }
 0x172   : > { %v523_v45 = vmul.f32 %v2632_v44, %v483_v15  ;;  %v526_v24 = vmul.f32 %v489_v17, %v2662_v52 }
 0x174   : > { %2258 = vmatmul.mubr.msk.f32.gmra.mxu1 %vm540_vm2, %v523_v45 }
 0x175   : > { %v487_v19 = vpop.permute.xlu1 %486  ;;  %2260 = vmatprep.mubr.msk.f32.mxu1 %vm540_vm2, %v524_v18  ;;  %v493_v21 = vpop.permute.xlu0 %492 }
 0x176   : > { %v525_v23 = vmul.f32 %v2645_v48, %v487_v19  ;;  %v528_v49 = vmul.f32 %v493_v21, %v2675_v55 }
 0x178   : > { %2261 = vmatmul.mubr.msk.f32.gmra.mxu1 %vm540_vm2, %v525_v23 }
 0x179   : > { %v491_v25 = vpop.permute.xlu1 %490  ;;  %2263 = vmatprep.mubr.msk.f32.mxu1 %vm540_vm2, %v526_v24  ;;  %v497_v26 = vpop.permute.xlu0 %496 }
 0x17a   : > { %v527_v44 = vmul.f32 %v2652_v50, %v491_v25  ;;  %v530_v29 = vmul.f32 %v497_v26, %v2687_v57 }
 0x17c   : > { %2264 = vmatmul.mubr.msk.f32.gmra.mxu1 %vm540_vm2, %v527_v44 }
 0x17d   : > { %v495_v27 = vpop.permute.xlu1 %494  ;;  %2266 = vmatprep.mubr.msk.f32.mxu1 %vm540_vm2, %v528_v49  ;;  %v1205_v28 = vpop.permute.xlu0 %1204 }
 0x17e   : > { %v529_v48 = vmul.f32 %v2670_v54, %v495_v27  ;;  %v1255_v52 = vsel %vm540_vm2, %v1205_v28, 0.0 }
 0x17f   : > { %1256 = vadd.xlane.f32.xlu1 %v1255_v52 }
 0x180   : > { %2267 = vmatmul.mubr.msk.f32.gmra.mxu1 %vm540_vm2, %v529_v48 }
 0x181   : > { %v499_v30 = vpop.permute.xlu1 %498  ;;  %2269 = vmatprep.mubr.msk.f32.mxu1 %vm540_vm2, %v530_v29  ;;  %v1081_v50 = vpop.permute.xlu0 %1080 }
 0x182   : > { %v531_v55 = vmul.f32 %v2681_v56, %v499_v30  ;;  %v1133_v31 = vsel %vm540_vm2, %v1081_v50, 0.0 }
 0x183   : > { %1134 = vadd.xlane.f32.xlu1 %v1133_v31 }
 0x184   : > { %2270 = vmatmul.mubr.msk.f32.gmra.mxu1 %vm540_vm2, %v531_v55 }
 0x185   : > { %v1079_v32 = vpop.permute.xlu1 %1078  ;;  %v1209_v54 = vpop.permute.xlu0 %1208 }
 0x186   : > { %v1130_v33 = vsel %vm540_vm2, %v1079_v32, 0.0  ;;  %v1261_v57 = vsel %vm540_vm2, %v1209_v54, 0.0 }
 0x187   : > { %1131 = vadd.xlane.f32.xlu0 %v1130_v33  ;;  %1262 = vadd.xlane.f32.xlu1 %v1261_v57 }
 0x189   : > { %v1207_v36 = vpop.permute.xlu1 %1206  ;;  %v1085_v43 = vpop.permute.xlu0 %1084 }
 0x18a   : > { %v1258_v47 = vsel %vm540_vm2, %v1207_v36, 0.0  ;;  %v1139_v35 = vsel %vm540_vm2, %v1085_v43, 0.0 }
 0x18b   : > { %1259 = vadd.xlane.f32.xlu0 %v1258_v47  ;;  %1140 = vadd.xlane.f32.xlu1 %v1139_v35 }
 0x18d   : > { %v1083_v56 = vpop.permute.xlu1 %1082  ;;  %v1213_v34 = vpop.permute.xlu0 %1212 }
 0x18e   : > { %v1136_v53 = vsel %vm540_vm2, %v1083_v56, 0.0  ;;  %v1267_v58 = vsel %vm540_vm2, %v1213_v34, 0.0 }
 0x18f   : > { %1137 = vadd.xlane.f32.xlu0 %v1136_v53  ;;  %1268 = vadd.xlane.f32.xlu1 %v1267_v58 }
 0x191   : > { %v1211_v61 = vpop.permute.xlu1 %1210  ;;  %v1089_v63 = vpop.permute.xlu0 %1088 }
 0x192   : > { %v1264_v1 = vsel %vm540_vm2, %v1211_v61, 0.0  ;;  %v1145_v38 = vsel %vm540_vm2, %v1089_v63, 0.0 }
 0x193   : > { %1265 = vadd.xlane.f32.xlu0 %v1264_v1  ;;  %1146 = vadd.xlane.f32.xlu1 %v1145_v38 }
 0x195   : > { %v1087_v37 = vpop.permute.xlu1 %1086  ;;  %v1217_v3 = vpop.permute.xlu0 %1216 }
 0x196   : > { %v1142_v7 = vsel %vm540_vm2, %v1087_v37, 0.0  ;;  %v1273_v9 = vsel %vm540_vm2, %v1217_v3, 0.0 }
 0x197   : > { %1143 = vadd.xlane.f32.xlu0 %v1142_v7  ;;  %1274 = vadd.xlane.f32.xlu1 %v1273_v9 }
 0x199   : > { %v1215_v11 = vpop.permute.xlu1 %1214  ;;  %v1093_v41 = vpop.permute.xlu0 %1092 }
 0x19a   : > { %v1270_v13 = vsel %vm540_vm2, %v1215_v11, 0.0  ;;  %v1151_v42 = vsel %vm540_vm2, %v1093_v41, 0.0 }
 0x19b   : > { %1271 = vadd.xlane.f32.xlu0 %v1270_v13  ;;  %1152 = vadd.xlane.f32.xlu1 %v1151_v42 }
 0x19d   : > { %v1091_v14 = vpop.permute.xlu1 %1090  ;;  %v1221_v15 = vpop.permute.xlu0 %1220 }
 0x19e   : > { %v1148_v17 = vsel %vm540_vm2, %v1091_v14, 0.0  ;;  %v1279_v45 = vsel %vm540_vm2, %v1221_v15, 0.0 }
 0x19f   : > { %1149 = vadd.xlane.f32.xlu0 %v1148_v17  ;;  %1280 = vadd.xlane.f32.xlu1 %v1279_v45 }
 0x1a1   : > { %v1219_v18 = vpop.permute.xlu1 %1218  ;;  %v1097_v19 = vpop.permute.xlu0 %1096 }
 0x1a2   : > { %v1276_v21 = vsel %vm540_vm2, %v1219_v18, 0.0  ;;  %v1157_v23 = vsel %vm540_vm2, %v1097_v19, 0.0 }
 0x1a3   : > { %1277 = vadd.xlane.f32.xlu0 %v1276_v21  ;;  %1158 = vadd.xlane.f32.xlu1 %v1157_v23 }
 0x1a5   : > { %v1095_v24 = vpop.permute.xlu1 %1094  ;;  %v1225_v25 = vpop.permute.xlu0 %1224 }
 0x1a6   : > { %v1154_v26 = vsel %vm540_vm2, %v1095_v24, 0.0  ;;  %v1285_v44 = vsel %vm540_vm2, %v1225_v25, 0.0 }
 0x1a7   : > { %1155 = vadd.xlane.f32.xlu0 %v1154_v26  ;;  %1286 = vadd.xlane.f32.xlu1 %v1285_v44 }
 0x1a9   : > { %v2873_v49 = vpop.permute.xlu1 %1451  ;;  %v2875_v27 = vpop.permute.xlu0 %1427 }
 0x1ad   : > { %v1223_v28 = vpop.permute.xlu1 %1222  ;;  %v1101_v48 = vpop.permute.xlu0 %1100 }
 0x1ae   : > { %v1282_v52 = vsel %vm540_vm2, %v1223_v28, 0.0  ;;  %v1163_v29 = vsel %vm540_vm2, %v1101_v48, 0.0 }
 0x1af   : > { %1283 = vadd.xlane.f32.xlu0 %v1282_v52  ;;  %1164 = vadd.xlane.f32.xlu1 %v1163_v29 }
 0x1b1   : > { %v1229_v30 = vpop.permute.xlu0 %1228  ;;  %v1099_v50 = vpop.permute.xlu1 %1098 }
 0x1b2   : > { %v1160_v55 = vsel %vm540_vm2, %v1099_v50, 0.0  ;;  %v1291_v31 = vsel %vm540_vm2, %v1229_v30, 0.0 }
 0x1b3   : > { %1161 = vadd.xlane.f32.xlu0 %v1160_v55  ;;  %1292 = vadd.xlane.f32.xlu1 %v1291_v31 }
 0x1b5   : > { %v1227_v32 = vpop.permute.xlu1 %1226 }
 0x1b6   : > { %v1288_v54 = vsel %vm540_vm2, %v1227_v32, 0.0 }
 0x1b7   : > { %1289 = vadd.xlane.f32.xlu0 %v1288_v54 }
 0x1e7   : > { %v1123_v33 = vpop.xlane.xlu0 %1122 }
 0x1e8   : > { %v1295_v43 = vmul.f32 0.03125, %v1123_v33 }
 0x1ea   : > { %v1327_v58 = vmul.f32 %v1295_v43, %v1295_v43  ;;  %v1359_v45 = vsub.f32 %v2616_v39, %v1295_v43 }
 0x1ec   : > { %v1248_v57 = vpop.xlane.xlu0 %1247 }
 0x1ed   : > { %v1310_v35 = vmul.f32 0.03125, %v1248_v57 }
 0x1f0   : > { %v1120_v36 = vpop.xlane.xlu1 %1119 }
 0x1f1   : > { %v1294_v47 = vmul.f32 0.03125, %v1120_v36 }
 0x1f3   : > { %v1326_v56 = vmul.f32 %v1294_v47, %v1294_v47  ;;  %v1358_v14 = vsub.f32 %v2620_v40, %v1294_v47 }
 0x1f4   : > { %v1126_v34 = vpop.xlane.xlu0 %1125  ;;  %v1251_v53 = vpop.xlane.xlu1 %1250 }
 0x1f5   : > { %v1342_v61 = vsub.f32 %v1310_v35, %v1326_v56  ;;  %v1296_v63 = vmul.f32 0.03125, %v1126_v34  ;;  %v1311_v1 = vmul.f32 0.03125, %v1251_v53 }
 0x1f7   : > { %v1374_v38 = vadd.f32 1e-05, %v1342_v61  ;;  %v1343_v37 = vsub.f32 %v1311_v1, %v1327_v58  ;;  %v1328_v7 = vmul.f32 %v1296_v63, %v1296_v63  ;;  %v1360_v40 = vsub.f32 %v2660_v51, %v1296_v63 }
 0x1f8   : > { %v1254_v3 = vpop.xlane.xlu0 %1253  ;;  %v1129_v42 = vpop.xlane.xlu1 %1128 }
 0x1f9   : > { %2330 = vrsqrt.f32 %v1374_v38  ;;  %v1375_v9 = vadd.f32 1e-05, %v1343_v37  ;;  %v1312_v11 = vmul.f32 0.03125, %v1254_v3  ;;  %v1297_v15 = vmul.f32 0.03125, %v1129_v42 }
 0x1fb   : > { %2332 = vrsqrt.f32 %v1375_v9  ;;  %v1344_v41 = vsub.f32 %v1312_v11, %v1328_v7  ;;  %v1329_v23 = vmul.f32 %v1297_v15, %v1297_v15 }
 0x1fd   : > { %v1376_v13 = vadd.f32 1e-05, %v1344_v41 }
 0x1ff   : > { %2334 = vrsqrt.f32 %v1376_v13  ;;  %v1361_v13 = vsub.f32 %v2641_v46, %v1297_v15 }
 0x206   : > { %v2331_v17 = vpop.eup %2330 }
 0x207   : > { %v1406_v18 = vmul.f32 %v2331_v17, %v1358_v14 }
 0x208   : > { %v2333_v19 = vpop.eup %2332  ;;  %v1257_v21 = vpop.xlane.xlu1 %1256 }
 0x209   : > { %v1313_v24 = vmul.f32 0.03125, %v1257_v21  ;;  %v1430_v25 = vmul.f32 %v2875_v27, %v1406_v18  ;;  %v1407_v26 = vmul.f32 %v2333_v19, %v1359_v45 }
 0x20b   : > { %v1345_v44 = vsub.f32 %v1313_v24, %v1329_v23  ;;  %v1454_v28 = vadd.f32 %v2873_v49, %v1430_v25  ;;  %v1431_v48 = vmul.f32 %v2875_v27, %v1407_v26 }
 0x20c   : > { %v2335_v52 = vpop.eup %2334  ;;  %v1135_v29 = vpop.xlane.xlu1 %1134 }
 0x20d   : > { %v1377_v30 = vadd.f32 1e-05, %v1345_v44  ;;  %v1299_v50 = vmul.f32 0.03125, %v1135_v29  ;;  %v1470_v39 = vmax.f32 %v1454_v28, 0.0  ;;  %v1455_v55 = vadd.f32 %v2873_v49, %v1431_v48 }
 0x20e   : > { %v1408_v31 = vmul.f32 %v2335_v52, %v1360_v40 }
 0x20f   : > { %2336 = vrsqrt.f32 %v1377_v30  ;;  %1518 = vrot.lane.b32.xlu0 %v1470_v39, %s2468_s7  ;;  %v1471_v32 = vmax.f32 %v1455_v55, 0.0  ;;  %v1331_v36 = vmul.f32 %v1299_v50, %v1299_v50  ;;  %v1363_v48 = vsub.f32 %v2700_v59, %v1299_v50 }
 0x210   : > { %v1132_v54 = vpop.xlane.xlu0 %1131  ;;  %v1263_v33 = vpop.xlane.xlu1 %1262  ;;  %v1432_v57 = vmul.f32 %v2875_v27, %v1408_v31 }
 0x211   : > { %v1298_v43 = vmul.f32 0.03125, %v1132_v54  ;;  %v1315_v47 = vmul.f32 0.03125, %v1263_v33  ;;  %1520 = vrot.lane.b32.xlu1 %v1471_v32, %s2468_s7 }
 0x212   : > { %v1456_v51 = vadd.f32 %v2873_v49, %v1432_v57 }
 0x213   : > { %v1347_v35 = vsub.f32 %v1315_v47, %v1331_v36  ;;  %v1330_v58 = vmul.f32 %v1298_v43, %v1298_v43  ;;  %v1362_v39 = vsub.f32 %v2708_v60, %v1298_v43 }
 0x214   : > { %v1260_v56 = vpop.xlane.xlu0 %1259  ;;  %v1141_v34 = vpop.xlane.xlu1 %1140  ;;  %v1472_v53 = vmax.f32 %v1456_v51, 0.0 }
 0x215   : > { %v1379_v61 = vadd.f32 1e-05, %v1347_v35  ;;  %v1314_v63 = vmul.f32 0.03125, %v1260_v56  ;;  %v1301_v1 = vmul.f32 0.03125, %v1141_v34 }
 0x216   : > { %1522 = vrot.lane.b32.xlu1 %v1472_v53, %s2468_s7 }
 0x217   : > { %2338 = vrsqrt.f32 %v1379_v61  ;;  %v1346_v38 = vsub.f32 %v1314_v63, %v1330_v58  ;;  %v1333_v9 = vmul.f32 %v1301_v1, %v1301_v1  ;;  %v1365_v59 = vsub.f32 %v2717_v62, %v1301_v1 }
 0x218   : > { %v1138_v37 = vpop.xlane.xlu0 %1137  ;;  %v1269_v3 = vpop.xlane.xlu1 %1268 }
 0x219   : > { %v1378_v7 = vadd.f32 1e-05, %v1346_v38  ;;  %v1300_v11 = vmul.f32 0.03125, %v1138_v37  ;;  %v1317_v41 = vmul.f32 0.03125, %v1269_v3 }
 0x21b   : > { %2340 = vrsqrt.f32 %v1378_v7  ;;  %v1349_v42 = vsub.f32 %v1317_v41, %v1333_v9  ;;  %v1332_v45 = vmul.f32 %v1300_v11, %v1300_v11  ;;  %v1364_v43 = vsub.f32 %v2726_v0, %v1300_v11  ;;  %v2250_v41 = vpop.f32.mrf.mxu0 }
 0x21c   : > { %v2337_v14 = vpop.eup %2336  ;;  %v1266_v17 = vpop.xlane.xlu0 %1265  ;;  %v538_v11 = vsub.s32 0, %v2516_v4 }
 0x21d   : > { %v1381_v18 = vadd.f32 1e-05, %v1349_v42  ;;  %v1316_v19 = vmul.f32 0.03125, %v1266_v17  ;;  %v1409_v21 = vmul.f32 %v2337_v14, %v1361_v13  ;;  %v655_v42 = vpop.f32.mrf.mxu0 }
 0x21e   : > { %v2920_v13 = vrot.slane %v2523_v5, %v538_v11 }
 0x21f   : > { %2342 = vrsqrt.f32 %v1381_v18  ;;  %v1348_v23 = vsub.f32 %v1316_v19, %v1332_v45  ;;  %v1433_v25 = vmul.f32 %v2875_v27, %v1409_v21 }
 0x220   : > { %v1144_v24 = vpop.xlane.xlu0 %1143  ;;  %v2926_v14 = vadd.f32 %v655_v42, %v2920_v13 }
 0x221   : > { %v1380_v26 = vadd.f32 1e-05, %v1348_v23  ;;  %v1302_v44 = vmul.f32 0.03125, %v1144_v24  ;;  %v1457_v28 = vadd.f32 %v2873_v49, %v1433_v25  ;;  %v2253_v17 = vpop.f32.mrf.mxu0 }
 0x222   : > { %v782_v18 = vmul.f32 %v2926_v14, %v2926_v14 }
 0x223   : > { %2344 = vrsqrt.f32 %v1380_v26  ;;  %v1473_v52 = vmax.f32 %v1457_v28, 0.0  ;;  %v1334_v40 = vmul.f32 %v1302_v44, %v1302_v44  ;;  %v1366_v1 = vsub.f32 %v2744_v6, %v1302_v44  ;;  %v665_v19 = vpop.f32.mrf.mxu0  ;;  %v1147_v44 = vpop.xlane.xlu1 %1146 }
 0x224   : > { %v2339_v46 = vpop.eup %2338  ;;  %v1272_v15 = vpop.xlane.xlu0 %1271  ;;  %v2923_v6 = vadd.f32 %v2250_v41, %v2920_v13  ;;  %v2933_v21 = vadd.f32 %v665_v19, %v2920_v13  ;;  %v798_v5 = vsel %vm540_vm2, %v782_v18, 0.0 }
 0x225   : > { %v1318_v29 = vmul.f32 0.03125, %v1272_v15  ;;  %v1411_v30 = vmul.f32 %v2339_v46, %v1363_v48  ;;  %1524 = vrot.lane.b32.xlu0 %v1473_v52, %s2468_s7 }
 0x226   : > { %v737_v45 = vsel %vm540_vm2, %v2923_v6, 0.0  ;;  %v740_v24 = vsel %vm540_vm2, %v2933_v21, 0.0  ;;  %v784_v25 = vmul.f32 %v2933_v21, %v2933_v21 }
 0x227   : > { %v1350_v55 = vsub.f32 %v1318_v29, %v1334_v40  ;;  %v1435_v32 = vmul.f32 %v2875_v27, %v1411_v30  ;;  %v1275_v15 = vpop.xlane.xlu1 %1274  ;;  %v734_v30 = vsel %vm540_vm2, %v2926_v14, 0.0 }
 0x228   : > { %v2341_v31 = vpop.eup %2340  ;;  %v804_v48 = vsel %vm540_vm2, %v784_v25, 0.0 }
 0x229   : > { %v1382_v54 = vadd.f32 1e-05, %v1350_v55  ;;  %v1410_v33 = vmul.f32 %v2341_v31, %v1362_v39  ;;  %v1459_v57 = vadd.f32 %v2873_v49, %v1435_v32  ;;  %v2256_v23 = vpop.f32.mrf.mxu1  ;;  %v783_v39 = vmul.f32 %v2923_v6, %v2923_v6 }
 0x22a   : > { %v2957_v32 = vadd.f32 %v2253_v17, %v2920_v13  ;;  %v1319_v17 = vmul.f32 0.03125, %v1275_v15 }
 0x22b   : > { %2346 = vrsqrt.f32 %v1382_v54  ;;  %v1475_v36 = vmax.f32 %v1459_v57, 0.0  ;;  %v1434_v47 = vmul.f32 %v2875_v27, %v1410_v33  ;;  %v675_v26 = vpop.f32.mrf.mxu1  ;;  %v801_v33 = vsel %vm540_vm2, %v783_v39, 0.0  ;;  %v1153_v57 = vpop.xlane.xlu1 %1152 }
 0x22c   : > { %v2343_v50 = vpop.eup %2342  ;;  %v2941_v28 = vadd.f32 %v675_v26, %v2920_v13 }
 0x22d   : > { %v1413_v51 = vmul.f32 %v2343_v50, %v1365_v59  ;;  %1528 = vrot.lane.b32.xlu0 %v1475_v36, %s2468_s7  ;;  %v1458_v60 = vadd.f32 %v2873_v49, %v1434_v47  ;;  %v743_v47 = vsel %vm540_vm2, %v2957_v32, 0.0 }
 0x22e   : > { %v746_v52 = vsel %vm540_vm2, %v2941_v28, 0.0  ;;  %v786_v40 = vmul.f32 %v2941_v28, %v2941_v28 }
 0x22f   : > { %v1474_v56 = vmax.f32 %v1458_v60, 0.0  ;;  %v1437_v34 = vmul.f32 %v2875_v27, %v1413_v51  ;;  %v785_v51 = vmul.f32 %v2957_v32, %v2957_v32  ;;  %v1281_v60 = vpop.xlane.xlu1 %1280 }
 0x230   : > { %v2345_v35 = vpop.eup %2344  ;;  %v810_v31 = vsel %vm540_vm2, %v786_v40, 0.0  ;;  %v1321_v40 = vmul.f32 0.03125, %v1281_v60 }
 0x231   : > { %v1412_v53 = vmul.f32 %v2345_v35, %v1364_v43  ;;  %1526 = vrot.lane.b32.xlu1 %v1474_v56, %s2468_s7  ;;  %v1461_v62 = vadd.f32 %v2873_v49, %v1437_v34  ;;  %v2973_v56 = vadd.f32 %v2256_v23, %v2920_v13 }
 0x233   : > { %v1477_v58 = vmax.f32 %v1461_v62, 0.0  ;;  %v1436_v61 = vmul.f32 %v2875_v27, %v1412_v53  ;;  %v807_v53 = vsel %vm540_vm2, %v785_v51, 0.0  ;;  %v1150_v62 = vpop.xlane.xlu0 %1149 }
 0x234   : > { %v2259_v46 = vpop.f32.mrf.mxu1 }
 0x235   : > { %1532 = vrot.lane.b32.xlu0 %v1477_v58, %s2468_s7  ;;  %v1460_v63 = vadd.f32 %v2873_v49, %v1436_v61  ;;  %v2993_v11 = vadd.f32 %v2259_v46, %v2920_v13 }
 0x236   : > { %v685_v29 = vpop.f32.mrf.mxu1 }
 0x237   : > { %v1476_v0 = vmax.f32 %v1460_v63, 0.0  ;;  %v2953_v55 = vadd.f32 %v685_v29, %v2920_v13  ;;  %v789_v25 = vmul.f32 %v2993_v11, %v2993_v11 }
 0x238   : > { %v2347_v38 = vpop.eup %2346  ;;  %v2262_v54 = vpop.f32.mrf.mxu1 }
 0x239   : > { %v1414_v37 = vmul.f32 %v2347_v38, %v1366_v1  ;;  %1530 = vrot.lane.b32.xlu1 %v1476_v0, %s2468_s7  ;;  %v752_v59 = vsel %vm540_vm2, %v2953_v55, 0.0  ;;  %v788_v50 = vmul.f32 %v2953_v55, %v2953_v55  ;;  %v749_v1 = vsel %vm540_vm2, %v2973_v56, 0.0  ;;  %v1159_v0 = vpop.xlane.xlu1 %1158 }
 0x23a   : > { %v695_v36 = vpop.f32.mrf.mxu1  ;;  %v787_v38 = vmul.f32 %v2973_v56, %v2973_v56  ;;  %v3015_v29 = vadd.f32 %v2262_v54, %v2920_v13  ;;  %v819_v39 = vsel %vm540_vm2, %v789_v25, 0.0 }
 0x23b   : > { %v1438_v3 = vmul.f32 %v2875_v27, %v1414_v37  ;;  %v2969_v43 = vadd.f32 %v695_v36, %v2920_v13  ;;  %v816_v35 = vsel %vm540_vm2, %v788_v50, 0.0  ;;  %v1278_v37 = vpop.xlane.xlu0 %1277  ;;  %v3024_v50 = vmul.f32 0.03125, %v1150_v62 }
 0x23c   : > { %v2975_v34 = vpop.f32.mrf.mxu1  ;;  %v813_v42 = vsel %vm540_vm2, %v787_v38, 0.0 }
 0x23d   : > { %v1462_v7 = vadd.f32 %v2873_v49, %v1438_v3  ;;  %v758_v58 = vsel %vm540_vm2, %v2969_v43, 0.0  ;;  %v790_v61 = vmul.f32 %v2969_v43, %v2969_v43 }
 0x23e   : > { %v705_v63 = vpop.f32.mrf.mxu1 }
 0x23f   : > { %v1478_v9 = vmax.f32 %v1462_v7, 0.0  ;;  %v2987_v3 = vadd.f32 %v705_v63, %v2920_v13  ;;  %v822_v7 = vsel %vm540_vm2, %v790_v61, 0.0  ;;  %v1156_v26 = vpop.xlane.xlu0 %1155  ;;  %v1320_v61 = vmul.f32 0.03125, %v1278_v37 }
 0x240   : > { %v2995_v41 = vpop.f32.mrf.mxu1 }
 0x241   : > { %1534 = vrot.lane.b32.xlu1 %v1478_v9, %s2468_s7  ;;  %v2990_v9 = vmul.f32 0.03125, %v1147_v44  ;;  %v764_v18 = vsel %vm540_vm2, %v2987_v3, 0.0  ;;  %v792_v19 = vmul.f32 %v2987_v3, %v2987_v3 }
 0x242   : > { %v715_v23 = vpop.f32.mrf.mxu1 }
 0x243   : > { %v3011_v15 = vadd.f32 %v715_v23, %v2920_v13 }
 0x245   : > { %v770_v54 = vsel %vm540_vm2, %v3011_v15, 0.0 }
 0x254   : > { %738 = vadd.xlane.f32.xlu0 %v737_v45  ;;  %v1287_v45 = vpop.xlane.xlu1 %1286 }
 0x255   : > { %v1323_v36 = vmul.f32 0.03125, %v1287_v45  ;;  %v3046_v45 = vadd.f32 %v2975_v34, %v2920_v13 }
 0x258   : > { %799 = vadd.xlane.f32.xlu0 %v798_v5  ;;  %v1335_v5 = vmul.f32 %v2990_v9, %v2990_v9  ;;  %v1165_v46 = vpop.xlane.xlu1 %1164 }
 0x259   : > { %v3036_v63 = vmul.f32 0.03125, %v1165_v46 }
 0x25a   : > { %v1351_v44 = vsub.f32 %v1319_v17, %v1335_v5 }
 0x25b   : > { %v1341_v23 = vmul.f32 %v3036_v63, %v3036_v63 }
 0x25c   : > { %741 = vadd.xlane.f32.xlu0 %v740_v24  ;;  %v755_v24 = vsel %vm540_vm2, %v2993_v11, 0.0 }
 0x260   : > { %805 = vadd.xlane.f32.xlu0 %v804_v48  ;;  %v3008_v48 = vmul.f32 0.03125, %v1153_v57  ;;  %v1383_v57 = vadd.f32 1e-05, %v1351_v44 }
 0x262   : > { %2348 = vrsqrt.f32 %v1383_v57 }
 0x264   : > { %747 = vadd.xlane.f32.xlu0 %v746_v52  ;;  %v828_v52 = vsel %vm540_vm2, %v792_v19, 0.0  ;;  %v3049_v19 = vmul.f32 0.03125, %v1156_v26  ;;  %v767_v26 = vsel %vm540_vm2, %v3046_v45, 0.0 }
 0x265   : > { %735 = vadd.xlane.f32.xlu1 %v734_v30  ;;  %v3017_v30 = vpop.f32.mrf.mxu1 }
 0x267   : > { %v725_v60 = vpop.f32.mrf.mxu1 }
 0x268   : > { %811 = vadd.xlane.f32.xlu0 %v810_v31  ;;  %v3020_v31 = vmul.f32 0.03125, %v1159_v0 }
 0x269   : > { %802 = vadd.xlane.f32.xlu1 %v801_v33  ;;  %v1284_v33 = vpop.xlane.xlu0 %1283 }
 0x26a   : > { %v1339_v62 = vmul.f32 %v3020_v31, %v3020_v31  ;;  %v1322_v25 = vmul.f32 0.03125, %v1284_v33  ;;  %v1606_v33 = vld [vmem:[%s3502_s3 + $0x38] sm:$0xff] }
 0x26b   : > { %2272 = vmatprep.subr.mxu1 %v1606_v33 }
 0x26c   : > { %753 = vadd.xlane.f32.xlu0 %v752_v59  ;;  %v1337_v59 = vmul.f32 %v3008_v48, %v3008_v48  ;;  %v1355_v38 = vsub.f32 %v1323_v36, %v1339_v62  ;;  %2273 = vmatpush3.msra.mxu1 %v1606_v33  ;;  %v1604_v62 = vld [vmem:[%s3502_s3 + $0x28] sm:$0xff] }
 0x26d   : > { %744 = vadd.xlane.f32.xlu1 %v743_v47  ;;  %v794_v47 = vmul.f32 %v3011_v15, %v3011_v15  ;;  %v1162_v0 = vpop.xlane.xlu0 %1161 }
 0x26e   : > { %v1353_v51 = vsub.f32 %v1321_v40, %v1337_v59  ;;  %v1338_v40 = vmul.f32 %v3049_v19, %v3049_v19  ;;  %v3066_v57 = vmul.f32 0.03125, %v1162_v0 }
 0x270   : > { %817 = vadd.xlane.f32.xlu0 %v816_v35  ;;  %v761_v35 = vsel %vm540_vm2, %v3015_v29, 0.0  ;;  %v1385_v17 = vadd.f32 1e-05, %v1353_v51  ;;  %v1354_v36 = vsub.f32 %v1322_v25, %v1338_v40  ;;  %v1600_v25 = vld [vmem:[%s3502_s3 + $0x8] sm:$0xff] }
 0x271   : > { %808 = vadd.xlane.f32.xlu1 %v807_v53  ;;  %v791_v53 = vmul.f32 %v3015_v29, %v3015_v29 }
 0x272   : > { %2350 = vrsqrt.f32 %v1385_v17  ;;  %v1367_v17 = vsub.f32 %v2735_v2, %v2990_v9 }
 0x273   : > { %v825_v37 = vsel %vm540_vm2, %v791_v53, 0.0 }
 0x274   : > { %759 = vadd.xlane.f32.xlu0 %v758_v58  ;;  %v1293_v58 = vpop.xlane.xlu1 %1292 }
 0x275   : > { %750 = vadd.xlane.f32.xlu1 %v749_v1  ;;  %v1336_v1 = vmul.f32 %v3024_v50, %v3024_v50 }
 0x277   : > { %v1352_v5 = vsub.f32 %v1320_v61, %v1336_v1  ;;  %v2349_v61 = vpop.eup %2348  ;;  %v1386_v1 = vadd.f32 1e-05, %v1354_v36 }
 0x278   : > { %823 = vadd.xlane.f32.xlu0 %v822_v7  ;;  %v3041_v7 = vadd.f32 %v725_v60, %v2920_v13  ;;  %v3074_v60 = vadd.f32 %v2995_v41, %v2920_v13  ;;  %v1603_v41 = vld [vmem:[%s3502_s3 + $0x20] sm:$0xff] }
 0x279   : > { %814 = vadd.xlane.f32.xlu1 %v813_v42  ;;  %v834_v42 = vsel %vm540_vm2, %v794_v47, 0.0  ;;  %v1384_v59 = vadd.f32 1e-05, %v1352_v5  ;;  %v1605_v47 = vld [vmem:[%s3502_s3 + $0x30] sm:$0xff] }
 0x27a   : > { %v776_v44 = vsel %vm540_vm2, %v3041_v7, 0.0  ;;  %v796_v34 = vmul.f32 %v3041_v7, %v3041_v7  ;;  %2274 = vmatprep.subr.mxu1 %v1605_v47  ;;  %v773_v0 = vsel %vm540_vm2, %v3074_v60, 0.0  ;;  %v1601_v5 = vld [vmem:[%s3502_s3 + $0x10] sm:$0xff] }
 0x27b   : > { %2275 = vmatpush3.msra.mxu1 %v1605_v47  ;;  %v1373_v47 = vsub.f32 %v2795_v20, %v3036_v63 }
 0x27c   : > { %765 = vadd.xlane.f32.xlu0 %v764_v18  ;;  %v1325_v18 = vmul.f32 0.03125, %v1293_v58  ;;  %v1340_v58 = vmul.f32 %v3066_v57, %v3066_v57  ;;  %2276 = vmatprep.subr.mxu1 %v1604_v62 }
 0x27d   : > { %756 = vadd.xlane.f32.xlu1 %v755_v24  ;;  %v1387_v24 = vadd.f32 1e-05, %v1355_v38  ;;  %2277 = vmatpush3.msra.mxu1 %v1604_v62 }
 0x27e   : > { %v1357_v46 = vsub.f32 %v1325_v18, %v1341_v23  ;;  %2278 = vmatprep.subr.mxu1 %v1603_v41  ;;  %v1602_v18 = vld [vmem:[%s3502_s3 + $0x18] sm:$0xff] }
 0x27f   : > { %2352 = vrsqrt.f32 %v1387_v24  ;;  %2279 = vmatpush3.msra.mxu1 %v1603_v41  ;;  %v3099_v24 = vadd.f32 %v3017_v30, %v2920_v13  ;;  %v2351_v9 = vpop.eup %2350  ;;  %v1599_v13 = vld [vmem:[%s3502_s3] sm:$0xff]  ;;  %v1372_v41 = vsub.f32 %v2804_v22, %v3066_v57 }
 0x280   : > { %829 = vadd.xlane.f32.xlu0 %v828_v52  ;;  %v793_v52 = vmul.f32 %v3046_v45, %v3046_v45  ;;  %v1389_v51 = vadd.f32 1e-05, %v1357_v46  ;;  %2354 = vrsqrt.f32 %v1384_v59  ;;  %2280 = vmatprep.subr.mxu1 %v1602_v18 }
 0x281   : > { %820 = vadd.xlane.f32.xlu1 %v819_v39  ;;  %v1290_v39 = vpop.xlane.xlu0 %1289  ;;  %2281 = vmatpush3.msra.mxu1 %v1602_v18  ;;  %v779_v46 = vsel %vm540_vm2, %v3099_v24, 0.0 }
 0x282   : > { %v831_v53 = vsel %vm540_vm2, %v793_v52, 0.0  ;;  %2356 = vrsqrt.f32 %v1389_v51  ;;  %2282 = vmatprep.subr.mxu1 %v1601_v5 }
 0x283   : > { %2358 = vrsqrt.f32 %v1386_v1  ;;  %2283 = vmatpush3.msra.mxu1 %v1601_v5 }
 0x284   : > { %771 = vadd.xlane.f32.xlu0 %v770_v54  ;;  %v840_v54 = vsel %vm540_vm2, %v796_v34, 0.0  ;;  %2284 = vmatprep.subr.mxu1 %v1600_v25 }
 0x285   : > { %762 = vadd.xlane.f32.xlu1 %v761_v35  ;;  %v1324_v35 = vmul.f32 0.03125, %v1290_v39  ;;  %2285 = vmatpush3.msra.mxu1 %v1600_v25 }
 0x286   : > { %2286 = vmatprep.subr.mxu1 %v1599_v13 }
 0x287   : > { %v1356_v38 = vsub.f32 %v1324_v35, %v1340_v58  ;;  %2287 = vmatpush3.msra.mxu1 %v1599_v13  ;;  %v1370_v58 = vsub.f32 %v2782_v16, %v3049_v19 }
 0x288   : > { %835 = vadd.xlane.f32.xlu0 %v834_v42  ;;  %v795_v42 = vmul.f32 %v3074_v60, %v3074_v60 }
 0x289   : > { %826 = vadd.xlane.f32.xlu1 %v825_v37  ;;  %v1415_v37 = vmul.f32 %v2349_v61, %v1367_v17  ;;  %v1388_v23 = vadd.f32 1e-05, %v1356_v38 }
 0x28a   : > { %v837_v2 = vsel %vm540_vm2, %v795_v42, 0.0 }
 0x28b   : > { %v1439_v34 = vmul.f32 %v2875_v27, %v1415_v37  ;;  %2360 = vrsqrt.f32 %v1388_v23 }
 0x28c   : > { %777 = vadd.xlane.f32.xlu0 %v776_v44  ;;  %v1369_v44 = vsub.f32 %v2753_v8, %v3008_v48  ;;  %v2353_v30 = vpop.eup %2352  ;;  %v1371_v8 = vsub.f32 %v2771_v12, %v3020_v31 }
 0x28d   : > { %768 = vadd.xlane.f32.xlu1 %v767_v26  ;;  %v797_v26 = vmul.f32 %v3099_v24, %v3099_v24  ;;  %v2355_v48 = vpop.eup %2354  ;;  %v1463_v39 = vadd.f32 %v2873_v49, %v1439_v34 }
 0x28e   : > { %v1417_v52 = vmul.f32 %v2351_v9, %v1369_v44  ;;  %v1419_v59 = vmul.f32 %v2353_v30, %v1371_v8  ;;  %v3152_v44 = vpop.permute.xlu1 %1520 }
 0x28f   : > { %v843_v40 = vsel %vm540_vm2, %v797_v26, 0.0  ;;  %v2357_v36 = vpop.eup %2356  ;;  %v1479_v35 = vmax.f32 %v1463_v39, 0.0 }
 0x290   : > { %841 = vadd.xlane.f32.xlu0 %v840_v54  ;;  %v1441_v33 = vmul.f32 %v2875_v27, %v1417_v52  ;;  %v1368_v54 = vsub.f32 %v2762_v10, %v3024_v50  ;;  %v1443_v31 = vmul.f32 %v2875_v27, %v1419_v59  ;;  %v2359_v62 = vpop.eup %2358 }
 0x291   : > { %832 = vadd.xlane.f32.xlu1 %v831_v53  ;;  %v1421_v53 = vmul.f32 %v2357_v36, %v1373_v47  ;;  %v1418_v63 = vmul.f32 %v2359_v62, %v1370_v58 }
 0x292   : > { %v1416_v51 = vmul.f32 %v2355_v48, %v1368_v54  ;;  %v1465_v12 = vadd.f32 %v2873_v49, %v1441_v33  ;;  %v1467_v50 = vadd.f32 %v2873_v49, %v1443_v31  ;;  %v3156_v13 = vpop.permute.xlu1 %1522 }
 0x293   : > { %v1445_v20 = vmul.f32 %v2875_v27, %v1421_v53  ;;  %v1442_v19 = vmul.f32 %v2875_v27, %v1418_v63 }
 0x294   : > { %v1440_v61 = vmul.f32 %v2875_v27, %v1416_v51  ;;  %v1481_v10 = vmax.f32 %v1465_v12, 0.0 }
 0x295   : > { %774 = vadd.xlane.f32.xlu1 %v773_v0  ;;  %v1483_v0 = vmax.f32 %v1467_v50, 0.0  ;;  %v1469_v16 = vadd.f32 %v2873_v49, %v1445_v20  ;;  %v1466_v37 = vadd.f32 %v2873_v49, %v1442_v19 }
 0x296   : > { %v1464_v38 = vadd.f32 %v2873_v49, %v1440_v61 }
 0x297   : > { %v1485_v17 = vmax.f32 %v1469_v16, 0.0  ;;  %v1482_v22 = vmax.f32 %v1466_v37, 0.0 }
 0x298   : > { %v2361_v1 = vpop.eup %2360  ;;  %v1480_v18 = vmax.f32 %v1464_v38, 0.0 }
 0x299   : > { %838 = vadd.xlane.f32.xlu1 %v837_v2  ;;  %v1420_v42 = vmul.f32 %v2361_v1, %v1372_v41  ;;  %v3146_v2 = vpop.permute.xlu0 %1518 }
 0x29b   : > { %v1444_v5 = vmul.f32 %v2875_v27, %v1420_v42 }
 0x29d   : > { %780 = vadd.xlane.f32.xlu1 %v779_v46  ;;  %v1468_v57 = vadd.f32 %v2873_v49, %v1444_v5  ;;  %v3148_v9 = vpop.permute.xlu0 %1524  ;;  %v996_v5 = vsub.s32 2, %v2516_v4 }
 0x29f   : > { %v1484_v23 = vmax.f32 %v1468_v57, 0.0 }
 0x2a1   : > { %844 = vadd.xlane.f32.xlu1 %v843_v40  ;;  %v3150_v25 = vpop.permute.xlu0 %1528 }
 0x2a3   : > { %v3158_v49 = vpop.permute.xlu1 %1526 }
 0x2a6   : > { %1536 = vrot.lane.b32.xlu0 %v1479_v35, %s2468_s7 }
 0x2a7   : > { %v3154_v27 = vpop.permute.xlu0 %1532 }
 0x2aa   : > { %1540 = vrot.lane.b32.xlu0 %v1481_v10, %s2468_s7 }
 0x2ab   : > { %v3160_v26 = vpop.permute.xlu1 %1530 }
 0x2ae   : > { %1544 = vrot.lane.b32.xlu0 %v1483_v0, %s2468_s7 }
 0x2b2   : > { %1548 = vrot.lane.b32.xlu0 %v1485_v17, %s2468_s7  ;;  %1538 = vrot.lane.b32.xlu1 %v1480_v18, %s2468_s7  ;;  %v976_v18 = vsub.s32 1, %v2516_v4 }
 0x2b3   : > { %v3162_v48 = vpop.permute.xlu1 %1534 }
 0x2b6   : > { %1542 = vrot.lane.b32.xlu1 %v1482_v22, %s2468_s7 }
 0x2ba   : > { %1546 = vrot.lane.b32.xlu1 %v1484_v23, %s2468_s7 }
 0x2dd   : > { %v739_v34 = vpop.xlane.xlu0 %738 }
 0x2de   : > { %v3166_v51 = vmul.f32 0.03125, %v739_v34 }
 0x2e0   : > { %v879_v10 = vmul.f32 %v3166_v51, %v3166_v51 }
 0x2e1   : > { %v800_v30 = vpop.xlane.xlu0 %799 }
 0x2e2   : > { %v862_v12 = vmul.f32 0.03125, %v800_v30 }
 0x2e5   : > { %v742_v46 = vpop.xlane.xlu0 %741 }
 0x2e6   : > { %v848_v52 = vmul.f32 0.03125, %v742_v46  ;;  %v3189_v46 = vld [vmem:[%s3503_s4] sm:$0xff] }
 0x2e8   : > { %v880_v40 = vmul.f32 %v848_v52, %v848_v52 }
 0x2e9   : > { %v806_v8 = vpop.xlane.xlu0 %805 }
 0x2ea   : > { %v864_v39 = vmul.f32 0.03125, %v806_v8  ;;  %v3192_v8 = vrot.slane %v3189_v46, %v976_v18 }
 0x2ec   : > { %v896_v33 = vsub.f32 %v864_v39, %v880_v40  ;;  %v912_v40 = vsub.f32 %v2933_v21, %v848_v52 }
 0x2ed   : > { %v748_v59 = vpop.xlane.xlu0 %747 }
 0x2ee   : > { %v928_v36 = vadd.f32 1e-05, %v896_v33  ;;  %v3164_v54 = vmul.f32 0.03125, %v748_v59  ;;  %v736_v47 = vpop.xlane.xlu1 %735 }
 0x2ef   : > { %v3168_v35 = vmul.f32 0.03125, %v736_v47  ;;  %v3196_v47 = vrot.slane %v3189_v46, %v996_v5  ;;  %v911_v5 = vsub.f32 %v2923_v6, %v3166_v51 }
 0x2f0   : > { %2362 = vrsqrt.f32 %v928_v36  ;;  %v882_v62 = vmul.f32 %v3164_v54, %v3164_v54 }
 0x2f1   : > { %v878_v31 = vmul.f32 %v3168_v35, %v3168_v35  ;;  %v812_v53 = vpop.xlane.xlu0 %811 }
 0x2f2   : > { %v866_v58 = vmul.f32 0.03125, %v812_v53  ;;  %v803_v61 = vpop.xlane.xlu1 %802 }
 0x2f3   : > { %v894_v50 = vsub.f32 %v862_v12, %v878_v31  ;;  %v863_v20 = vmul.f32 0.03125, %v803_v61 }
 0x2f4   : > { %v898_v63 = vsub.f32 %v866_v58, %v882_v62 }
 0x2f5   : > { %v926_v1 = vadd.f32 1e-05, %v894_v50  ;;  %v895_v41 = vsub.f32 %v863_v20, %v879_v10  ;;  %v754_v38 = vpop.xlane.xlu0 %753 }
 0x2f6   : > { %v930_v0 = vadd.f32 1e-05, %v898_v63  ;;  %v3176_v16 = vmul.f32 0.03125, %v754_v38  ;;  %v745_v19 = vpop.xlane.xlu1 %744 }
 0x2f7   : > { %2364 = vrsqrt.f32 %v926_v1  ;;  %v927_v42 = vadd.f32 1e-05, %v895_v41  ;;  %v3178_v17 = vmul.f32 0.03125, %v745_v19  ;;  %v910_v1 = vsub.f32 %v2926_v14, %v3168_v35 }
 0x2f8   : > { %2366 = vrsqrt.f32 %v930_v0  ;;  %v884_v22 = vmul.f32 %v3176_v16, %v3176_v16 }
 0x2f9   : > { %2368 = vrsqrt.f32 %v927_v42  ;;  %v818_v37 = vpop.xlane.xlu0 %817  ;;  %v881_v34 = vmul.f32 %v3178_v17, %v3178_v17  ;;  %v914_v42 = vsub.f32 %v2941_v28, %v3164_v54 }
 0x2fa   : > { %v868_v57 = vmul.f32 0.03125, %v818_v37  ;;  %v809_v23 = vpop.xlane.xlu1 %808 }
 0x2fb   : > { %v865_v30 = vmul.f32 0.03125, %v809_v23 }
 0x2fc   : > { %v900_v39 = vsub.f32 %v868_v57, %v884_v22 }
 0x2fd   : > { %v2363_v33 = vpop.eup %2362  ;;  %v897_v59 = vsub.f32 %v865_v30, %v881_v34  ;;  %v760_v36 = vpop.xlane.xlu0 %759 }
 0x2fe   : > { %v960_v12 = vmul.f32 %v2363_v33, %v912_v40  ;;  %v932_v31 = vadd.f32 1e-05, %v900_v39  ;;  %v3198_v53 = vmul.f32 0.03125, %v760_v36  ;;  %v751_v62 = vpop.xlane.xlu1 %750 }
 0x2ff   : > { %v929_v58 = vadd.f32 1e-05, %v897_v59  ;;  %v3200_v61 = vmul.f32 0.03125, %v751_v62 }
 0x300   : > { %v980_v10 = vmul.f32 %v3192_v8, %v960_v12  ;;  %2370 = vrsqrt.f32 %v932_v31  ;;  %v886_v50 = vmul.f32 %v3198_v53, %v3198_v53 }
 0x301   : > { %2372 = vrsqrt.f32 %v929_v58  ;;  %v824_v21 = vpop.xlane.xlu0 %823  ;;  %v883_v41 = vmul.f32 %v3200_v61, %v3200_v61 }
 0x302   : > { %v1000_v52 = vadd.f32 %v3196_v47, %v980_v10  ;;  %v870_v20 = vmul.f32 0.03125, %v824_v21  ;;  %v815_v63 = vpop.xlane.xlu1 %814 }
 0x303   : > { %v867_v38 = vmul.f32 0.03125, %v815_v63 }
 0x304   : > { %v2365_v0 = vpop.eup %2364  ;;  %v1016_v19 = vmax.f32 %v1000_v52, 0.0  ;;  %v902_v18 = vsub.f32 %v870_v20, %v886_v50  ;;  %v916_v20 = vsub.f32 %v2953_v55, %v3176_v16 }
 0x305   : > { %v2367_v37 = vpop.eup %2366  ;;  %v958_v22 = vmul.f32 %v2365_v0, %v910_v1  ;;  %v899_v57 = vsub.f32 %v867_v38, %v883_v41  ;;  %v766_v23 = vpop.xlane.xlu0 %765  ;;  %v913_v38 = vsub.f32 %v2957_v32, %v3178_v17 }
 0x306   : > { %v2369_v34 = vpop.eup %2368  ;;  %1488 = vst.msk [vmem:[#allocation2 + $0x10] sm:$0xff] %vm540_vm2, %v1016_v19  ;;  %v962_v14 = vmul.f32 %v2367_v37, %v914_v42  ;;  %v934_v35 = vadd.f32 1e-05, %v902_v18  ;;  %v3215_v30 = vmul.f32 0.03125, %v766_v23  ;;  %v757_v40 = vpop.xlane.xlu1 %756 }
 0x307   : > { %1569 = vst.msk [vmem:[#allocation2 + $0x10] sm:$0xff] %vm1566_vm3, %v3156_v13  ;;  %v978_v28 = vmul.f32 %v3192_v8, %v958_v22  ;;  %v959_v54 = vmul.f32 %v2369_v34, %v911_v5  ;;  %v931_v39 = vadd.f32 1e-05, %v899_v57  ;;  %v3220_v33 = vmul.f32 0.03125, %v757_v40 }
 0x308   : > { %v982_v6 = vmul.f32 %v3192_v8, %v962_v14  ;;  %2374 = vrsqrt.f32 %v934_v35  ;;  %v888_v13 = vmul.f32 %v3215_v30, %v3215_v30 }
 0x309   : > { %v998_v51 = vadd.f32 %v3196_v47, %v978_v28  ;;  %v979_v59 = vmul.f32 %v3192_v8, %v959_v54  ;;  %2376 = vrsqrt.f32 %v931_v39  ;;  %v830_v36 = vpop.xlane.xlu0 %829  ;;  %v885_v21 = vmul.f32 %v3220_v33, %v3220_v33 }
 0x30a   : > { %v1002_v12 = vadd.f32 %v3196_v47, %v982_v6  ;;  %v872_v31 = vmul.f32 0.03125, %v830_v36  ;;  %v821_v62 = vpop.xlane.xlu1 %820  ;;  %v918_v54 = vsub.f32 %v2969_v43, %v3198_v53 }
 0x30b   : > { %v1014_v58 = vmax.f32 %v998_v51, 0.0  ;;  %v999_v10 = vadd.f32 %v3196_v47, %v979_v59  ;;  %v869_v52 = vmul.f32 0.03125, %v821_v62  ;;  %v915_v59 = vsub.f32 %v2973_v56, %v3200_v61 }
 0x30c   : > { %v1018_v50 = vmax.f32 %v1002_v12, 0.0  ;;  %v904_v63 = vsub.f32 %v872_v31, %v888_v13 }
 0x30d   : > { %v2371_v1 = vpop.eup %2370  ;;  %1486 = vst.msk [vmem:[#allocation2] sm:$0xff] %vm540_vm2, %v1014_v58  ;;  %v1015_v41 = vmax.f32 %v999_v10, 0.0  ;;  %v901_v0 = vsub.f32 %v869_v52, %v885_v21  ;;  %v772_v19 = vpop.xlane.xlu0 %771 }
 0x30e   : > { %v2373_v42 = vpop.eup %2372  ;;  %1567 = vst.msk [vmem:[#allocation2] sm:$0xff] %vm1566_vm3, %v3146_v2  ;;  %v964_v18 = vmul.f32 %v2371_v1, %v916_v20  ;;  %v936_v37 = vadd.f32 1e-05, %v904_v63  ;;  %v3239_v5 = vmul.f32 0.03125, %v772_v19  ;;  %v763_v55 = vpop.xlane.xlu1 %762 }
 0x30f   : > { %1490 = vst.msk [vmem:[#allocation2 + $0x20] sm:$0xff] %vm540_vm2, %v1018_v50  ;;  %1487 = vst.msk [vmem:[#allocation2 + $0x8] sm:$0xff] %vm540_vm2, %v1015_v41  ;;  %v961_v16 = vmul.f32 %v2373_v42, %v913_v38  ;;  %v933_v32 = vadd.f32 1e-05, %v901_v0  ;;  %v3244_v17 = vmul.f32 0.03125, %v763_v55  ;;  %v1585_v50 = vld [vmem:[#allocation2 + $0x10] sm:$0xff] }
 0x310   : > { %1571 = vst.msk [vmem:[#allocation2 + $0x20] sm:$0xff] %vm1566_vm3, %v3158_v49  ;;  %1568 = vst.msk [vmem:[#allocation2 + $0x8] sm:$0xff] %vm1566_vm3, %v3152_v44  ;;  %v984_v2 = vmul.f32 %v3192_v8, %v964_v18  ;;  %2378 = vrsqrt.f32 %v936_v37  ;;  %v890_v49 = vmul.f32 %v3239_v5, %v3239_v5  ;;  %v920_v18 = vsub.f32 %v2987_v3, %v3215_v30 }
 0x311   : > { %v981_v22 = vmul.f32 %v3192_v8, %v961_v16  ;;  %2380 = vrsqrt.f32 %v933_v32  ;;  %v836_v57 = vpop.xlane.xlu0 %835  ;;  %v887_v40 = vmul.f32 %v3244_v17, %v3244_v17  ;;  %v917_v32 = vsub.f32 %v2993_v11, %v3220_v33 }
 0x312   : > { %v1004_v23 = vadd.f32 %v3196_v47, %v984_v2  ;;  %v874_v34 = vmul.f32 0.03125, %v836_v57  ;;  %v827_v14 = vpop.xlane.xlu1 %826 }
 0x313   : > { %v1001_v35 = vadd.f32 %v3196_v47, %v981_v22  ;;  %v871_v44 = vmul.f32 0.03125, %v827_v14 }
 0x314   : > { %v1020_v28 = vmax.f32 %v1004_v23, 0.0  ;;  %v906_v39 = vsub.f32 %v874_v34, %v890_v49 }
 0x315   : > { %v2375_v6 = vpop.eup %2374  ;;  %v1017_v51 = vmax.f32 %v1001_v35, 0.0  ;;  %v903_v36 = vsub.f32 %v871_v44, %v887_v40  ;;  %v778_v12 = vpop.xlane.xlu0 %777  ;;  %v1583_v13 = vld [vmem:[#allocation2] sm:$0xff] }
 0x316   : > { %v2377_v31 = vpop.eup %2376  ;;  %1492 = vst.msk [vmem:[#allocation2 + $0x30] sm:$0xff] %vm540_vm2, %v1020_v28  ;;  %v966_v62 = vmul.f32 %v2375_v6, %v918_v54  ;;  %v938_v58 = vadd.f32 1e-05, %v906_v39  ;;  %v3261_v10 = vmul.f32 0.03125, %v778_v12  ;;  %2288 = vmatprep.mubr.msk.f32.mxu1 %vm1611_vm4, %v1583_v13  ;;  %v769_v21 = vpop.xlane.xlu1 %768  ;;  %v922_v54 = vsub.f32 %v3011_v15, %v3239_v5 }
 0x317   : > { %1573 = vst.msk [vmem:[#allocation2 + $0x30] sm:$0xff] %vm1566_vm3, %v3160_v26  ;;  %v963_v43 = vmul.f32 %v2377_v31, %v915_v59  ;;  %v935_v56 = vadd.f32 1e-05, %v903_v36  ;;  %v3267_v53 = vmul.f32 0.03125, %v769_v21  ;;  %v1584_v61 = vld [vmem:[#allocation2 + $0x8] sm:$0xff]  ;;  %v1587_v11 = vld [vmem:[#allocation2 + $0x20] sm:$0xff]  ;;  %v919_v59 = vsub.f32 %v3015_v29, %v3244_v17 }
 0x318   : > { %1489 = vst.msk [vmem:[#allocation2 + $0x18] sm:$0xff] %vm540_vm2, %v1017_v51  ;;  %v986_v52 = vmul.f32 %v3192_v8, %v966_v62  ;;  %2382 = vrsqrt.f32 %v938_v58  ;;  %2289 = vmatmul.mubr.msk.f32.vlgmr.msra.gmra.mxu1 %vm1611_vm4, %v1584_v61  ;;  %v892_v1 = vmul.f32 %v3261_v10, %v3261_v10 }
 0x319   : > { %1570 = vst.msk [vmem:[#allocation2 + $0x18] sm:$0xff] %vm1566_vm3, %v3148_v9  ;;  %v983_v20 = vmul.f32 %v3192_v8, %v963_v43  ;;  %2384 = vrsqrt.f32 %v935_v56  ;;  %v842_v26 = vpop.xlane.xlu0 %841  ;;  %2291 = vmatprep.mubr.msk.f32.mxu1 %vm1611_vm4, %v1585_v50  ;;  %v889_v0 = vmul.f32 %v3267_v53, %v3267_v53 }
 0x31a   : > { %v1006_v63 = vadd.f32 %v3196_v47, %v986_v52  ;;  %v876_v41 = vmul.f32 0.03125, %v842_v26  ;;  %v833_v38 = vpop.xlane.xlu1 %832 }
 0x31b   : > { %v1003_v9 = vadd.f32 %v3196_v47, %v983_v20  ;;  %v873_v19 = vmul.f32 0.03125, %v833_v38 }
 0x31c   : > { %v1022_v42 = vmax.f32 %v1006_v63, 0.0  ;;  %v908_v37 = vsub.f32 %v876_v41, %v892_v1  ;;  %v921_v63 = vsub.f32 %v3046_v45, %v3267_v53 }
 0x31d   : > { %v2379_v55 = vpop.eup %2378  ;;  %v1019_v16 = vmax.f32 %v1003_v9, 0.0  ;;  %v905_v2 = vsub.f32 %v873_v19, %v889_v0  ;;  %v1537_v19 = vpop.permute.xlu0 %1536 }
 0x31e   : > { %v2381_v22 = vpop.eup %2380  ;;  %1494 = vst.msk [vmem:[#allocation2 + $0x40] sm:$0xff] %vm540_vm2, %v1022_v42  ;;  %v940_v57 = vadd.f32 1e-05, %v908_v37  ;;  %v775_v23 = vpop.xlane.xlu1 %774  ;;  %v968_v49 = vmul.f32 %v2379_v55, %v920_v18  ;;  %v1589_v15 = vld [vmem:[#allocation2 + $0x30] sm:$0xff] }
 0x31f   : > { %1575 = vst.msk [vmem:[#allocation2 + $0x40] sm:$0xff] %vm1566_vm3, %v3162_v48  ;;  %v965_v34 = vmul.f32 %v2381_v22, %v917_v32  ;;  %v937_v3 = vadd.f32 1e-05, %v905_v2  ;;  %v3289_v30 = vmul.f32 0.03125, %v775_v23 }
 0x320   : > { %1491 = vst.msk [vmem:[#allocation2 + $0x28] sm:$0xff] %vm540_vm2, %v1019_v16  ;;  %v1586_v14 = vld [vmem:[#allocation2 + $0x18] sm:$0xff]  ;;  %2386 = vrsqrt.f32 %v940_v57  ;;  %v988_v33 = vmul.f32 %v3192_v8, %v968_v49 }
 0x321   : > { %1572 = vst.msk [vmem:[#allocation2 + $0x28] sm:$0xff] %vm1566_vm3, %v3150_v25  ;;  %2292 = vmatmul.mubr.msk.f32.gmra.mxu1 %vm1611_vm4, %v1586_v14  ;;  %v985_v35 = vmul.f32 %v3192_v8, %v965_v34  ;;  %2388 = vrsqrt.f32 %v937_v3  ;;  %v891_v28 = vmul.f32 %v3289_v30, %v3289_v30  ;;  %v923_v2 = vsub.f32 %v3074_v60, %v3289_v30  ;;  %v1541_v49 = vpop.permute.xlu0 %1540 }
 0x322   : > { %2294 = vmatprep.mubr.msk.f32.mxu1 %vm1611_vm4, %v1587_v11  ;;  %v839_v48 = vpop.xlane.xlu1 %838  ;;  %v1008_v40 = vadd.f32 %v3196_v47, %v988_v33 }
 0x323   : > { %v1005_v44 = vadd.f32 %v3196_v47, %v985_v35  ;;  %v875_v25 = vmul.f32 0.03125, %v839_v48 }
 0x324   : > { %v1024_v39 = vmax.f32 %v1008_v40, 0.0 }
 0x325   : > { %v2383_v6 = vpop.eup %2382  ;;  %v1021_v51 = vmax.f32 %v1005_v44, 0.0  ;;  %v907_v36 = vsub.f32 %v875_v25, %v891_v28  ;;  %v1545_v48 = vpop.permute.xlu0 %1544 }
 0x326   : > { %v2385_v12 = vpop.eup %2384  ;;  %v781_v13 = vpop.xlane.xlu1 %780  ;;  %1496 = vst.msk [vmem:[#allocation2 + $0x50] sm:$0xff] %vm540_vm2, %v1024_v39  ;;  %v970_v31 = vmul.f32 %v2383_v6, %v922_v54  ;;  %v1591_v45 = vld [vmem:[#allocation2 + $0x40] sm:$0xff] }
 0x327   : > { %1493 = vst.msk [vmem:[#allocation2 + $0x38] sm:$0xff] %vm540_vm2, %v1021_v51  ;;  %v967_v62 = vmul.f32 %v2385_v12, %v919_v59  ;;  %v939_v58 = vadd.f32 1e-05, %v907_v36  ;;  %v3307_v21 = vmul.f32 0.03125, %v781_v13 }
 0x328   : > { %v1588_v43 = vld [vmem:[#allocation2 + $0x28] sm:$0xff]  ;;  %1574 = vst.msk [vmem:[#allocation2 + $0x38] sm:$0xff] %vm1566_vm3, %v3154_v27  ;;  %v990_v29 = vmul.f32 %v3192_v8, %v970_v31  ;;  %v924_v27 = vsub.f32 %v3041_v7, %v3261_v10 }
 0x329   : > { %2295 = vmatmul.mubr.msk.f32.gmra.mxu1 %vm1611_vm4, %v1588_v43  ;;  %v987_v5 = vmul.f32 %v3192_v8, %v967_v62  ;;  %2390 = vrsqrt.f32 %v939_v58  ;;  %v893_v52 = vmul.f32 %v3307_v21, %v3307_v21  ;;  %v925_v33 = vsub.f32 %v3099_v24, %v3307_v21  ;;  %v1549_v6 = vpop.permute.xlu0 %1548 }
 0x32a   : > { %2297 = vmatprep.mubr.msk.f32.mxu1 %vm1611_vm4, %v1589_v15  ;;  %v845_v17 = vpop.xlane.xlu1 %844  ;;  %v1010_v56 = vadd.f32 %v3196_v47, %v990_v29 }
 0x32b   : > { %v1007_v61 = vadd.f32 %v3196_v47, %v987_v5  ;;  %v877_v50 = vmul.f32 0.03125, %v845_v17 }
 0x32c   : > { %v1026_v20 = vmax.f32 %v1010_v56, 0.0 }
 0x32d   : > { %v2387_v26 = vpop.eup %2386  ;;  %v1023_v1 = vmax.f32 %v1007_v61, 0.0  ;;  %v909_v41 = vsub.f32 %v877_v50, %v893_v52 }
 0x32e   : > { %v2389_v38 = vpop.eup %2388  ;;  %v1539_v9 = vpop.permute.xlu1 %1538  ;;  %1498 = vst.msk [vmem:[#allocation2 + $0x60] sm:$0xff] %vm540_vm2, %v1026_v20  ;;  %v972_v0 = vmul.f32 %v2387_v26, %v924_v27 }
 0x32f   : > { %1495 = vst.msk [vmem:[#allocation2 + $0x48] sm:$0xff] %vm540_vm2, %v1023_v1  ;;  %v969_v42 = vmul.f32 %v2389_v38, %v921_v63  ;;  %v941_v18 = vadd.f32 1e-05, %v909_v41  ;;  %v1590_v7 = vld [vmem:[#allocation2 + $0x38] sm:$0xff] }
 0x330   : > { %1577 = vst.msk [vmem:[#allocation2 + $0x50] sm:$0xff] %vm1566_vm3, %v1539_v9  ;;  %1576 = vst.msk [vmem:[#allocation2 + $0x48] sm:$0xff] %vm1566_vm3, %v1537_v19  ;;  %2298 = vmatmul.mubr.msk.f32.gmra.mxu1 %vm1611_vm4, %v1590_v7  ;;  %v992_v10 = vmul.f32 %v3192_v8, %v972_v0 }
 0x331   : > { %v989_v53 = vmul.f32 %v3192_v8, %v969_v42  ;;  %2392 = vrsqrt.f32 %v941_v18  ;;  %2300 = vmatprep.mubr.msk.f32.mxu1 %vm1611_vm4, %v1591_v45 }
 0x332   : > { %v1543_v37 = vpop.permute.xlu1 %1542  ;;  %v1012_v55 = vadd.f32 %v3196_v47, %v992_v10 }
 0x333   : > { %v1009_v16 = vadd.f32 %v3196_v47, %v989_v53  ;;  %1579 = vst.msk [vmem:[#allocation2 + $0x60] sm:$0xff] %vm1566_vm3, %v1543_v37 }
 0x334   : > { %v1028_v32 = vmax.f32 %v1012_v55, 0.0 }
 0x335   : > { %v1025_v22 = vmax.f32 %v1009_v16, 0.0 }
 0x336   : > { %v2391_v57 = vpop.eup %2390  ;;  %1500 = vst.msk [vmem:[#allocation2 + $0x70] sm:$0xff] %vm540_vm2, %v1028_v32  ;;  %v1547_v23 = vpop.permute.xlu1 %1546 }
 0x337   : > { %1497 = vst.msk [vmem:[#allocation2 + $0x58] sm:$0xff] %vm540_vm2, %v1025_v22  ;;  %v971_v34 = vmul.f32 %v2391_v57, %v923_v2  ;;  %v1592_v3 = vld [vmem:[#allocation2 + $0x48] sm:$0xff]  ;;  %v1593_v14 = vld [vmem:[#allocation2 + $0x50] sm:$0xff] }
 0x338   : > { %1581 = vst.msk [vmem:[#allocation2 + $0x70] sm:$0xff] %vm1566_vm3, %v1547_v23  ;;  %1578 = vst.msk [vmem:[#allocation2 + $0x58] sm:$0xff] %vm1566_vm3, %v1541_v49  ;;  %2301 = vmatmul.mubr.msk.f32.gmra.mxu1 %vm1611_vm4, %v1592_v3 }
 0x339   : > { %v991_v11 = vmul.f32 %v3192_v8, %v971_v34  ;;  %2303 = vmatprep.mubr.msk.f32.mxu1 %vm1611_vm4, %v1593_v14 }
 0x33a   : > { %v1595_v28 = vld [vmem:[#allocation2 + $0x60] sm:$0xff] }
 0x33b   : > { %v1011_v60 = vadd.f32 %v3196_v47, %v991_v11 }
 0x33d   : > { %v1027_v30 = vmax.f32 %v1011_v60, 0.0 }
 0x33e   : > { %v2393_v35 = vpop.eup %2392 }
 0x33f   : > { %1499 = vst.msk [vmem:[#allocation2 + $0x68] sm:$0xff] %vm540_vm2, %v1027_v30  ;;  %v973_v40 = vmul.f32 %v2393_v35, %v925_v33  ;;  %v1594_v44 = vld [vmem:[#allocation2 + $0x58] sm:$0xff]  ;;  %v1597_v51 = vld [vmem:[#allocation2 + $0x70] sm:$0xff] }
 0x340   : > { %1580 = vst.msk [vmem:[#allocation2 + $0x68] sm:$0xff] %vm1566_vm3, %v1545_v48  ;;  %2304 = vmatmul.mubr.msk.f32.gmra.mxu1 %vm1611_vm4, %v1594_v44 }
 0x341   : > { %v993_v25 = vmul.f32 %v3192_v8, %v973_v40  ;;  %2306 = vmatprep.mubr.msk.f32.mxu1 %vm1611_vm4, %v1595_v28  ;;  %v1609_v8 = vsub.s32 6, %v2516_v4 }
 0x343   : > { %v1013_v54 = vadd.f32 %v3196_v47, %v993_v25  ;;  %v3359_v36 = vrot.slane %v3189_v46, %v1609_v8 }
 0x345   : > { %v1029_v39 = vmax.f32 %v1013_v54, 0.0 }
 0x347   : > { %1501 = vst.msk [vmem:[#allocation2 + $0x78] sm:$0xff] %vm540_vm2, %v1029_v39  ;;  %v1596_v24 = vld [vmem:[#allocation2 + $0x68] sm:$0xff] }
 0x348   : > { %1582 = vst.msk [vmem:[#allocation2 + $0x78] sm:$0xff] %vm1566_vm3, %v1549_v6  ;;  %2307 = vmatmul.mubr.msk.f32.gmra.mxu1 %vm1611_vm4, %v1596_v24 }
 0x349   : > { %2309 = vmatprep.mubr.msk.f32.mxu1 %vm1611_vm4, %v1597_v51 }
 0x34f   : > { %v1598_v59 = vld [vmem:[#allocation2 + $0x78] sm:$0xff] }
 0x350   : > { %2310 = vmatmul.mubr.msk.f32.gmra.mxu1 %vm1611_vm4, %v1598_v59 }
 0x3d8   : > { %v2290_v47 = vpop.f32.mrf.mxu1 }
 0x3d9   : > { %v3362_v12 = vadd.f32 %v2290_v47, %v3359_v36 }
 0x3da   : > { %v1726_v13 = vpop.f32.mrf.mxu1 }
 0x3db   : > { %v2112_v31 = vmul.f32 -1.442695, %v3362_v12  ;;  %v3366_v62 = vadd.f32 %v1726_v13, %v3359_v36 }
 0x3dd   : > { %2394 = vpow2.f32 %v2112_v31  ;;  %v2111_v58 = vmul.f32 -1.442695, %v3366_v62 }
 0x3df   : > { %2396 = vpow2.f32 %v2111_v58 }
 0x3e1   : > { %v2293_v21 = vpop.f32.mrf.mxu1 }
 0x3e2   : > { %v3370_v4 = vadd.f32 %v2293_v21, %v3359_v36 }
 0x3e3   : > { %v1736_v46 = vpop.f32.mrf.mxu1 }
 0x3e4   : > { %v2114_v43 = vmul.f32 -1.442695, %v3370_v4  ;;  %v3374_v15 = vadd.f32 %v1736_v46, %v3359_v36 }
 0x3e6   : > { %2398 = vpow2.f32 %v2114_v43  ;;  %v2113_v29 = vmul.f32 -1.442695, %v3374_v15 }
 0x3e8   : > { %2400 = vpow2.f32 %v2113_v29 }
 0x3e9   : > { %v2296_v5 = vpop.f32.mrf.mxu1 }
 0x3ea   : > { %v3378_v17 = vadd.f32 %v2296_v5, %v3359_v36  ;;  %v2395_v56 = vpop.eup %2394 }
 0x3eb   : > { %v1746_v61 = vpop.f32.mrf.mxu1  ;;  %v1854_v52 = vadd.f32 1.0, %v2395_v56 }
 0x3ec   : > { %v2116_v50 = vmul.f32 -1.442695, %v3378_v17  ;;  %v3382_v27 = vadd.f32 %v1746_v61, %v3359_v36  ;;  %v2397_v20 = vpop.eup %2396 }
 0x3ed   : > { %2402 = vrcp.f32 %v1854_v52  ;;  %v1853_v26 = vadd.f32 1.0, %v2397_v20 }
 0x3ee   : > { %v2115_v63 = vmul.f32 -1.442695, %v3382_v27  ;;  %2404 = vpow2.f32 %v2116_v50 }
 0x3ef   : > { %2406 = vrcp.f32 %v1853_v26 }
 0x3f0   : > { %2408 = vpow2.f32 %v2115_v63  ;;  %v2299_v1 = vpop.f32.mrf.mxu1 }
 0x3f1   : > { %v3386_v41 = vadd.f32 %v2299_v1, %v3359_v36 }
 0x3f2   : > { %v1756_v9 = vpop.f32.mrf.mxu1 }
 0x3f3   : > { %v2399_v38 = vpop.eup %2398  ;;  %v2118_v19 = vmul.f32 -1.442695, %v3386_v41  ;;  %v3390_v42 = vadd.f32 %v1756_v9, %v3359_v36 }
 0x3f4   : > { %v1856_v0 = vadd.f32 1.0, %v2399_v38 }
 0x3f5   : > { %v2401_v18 = vpop.eup %2400  ;;  %v2117_v45 = vmul.f32 -1.442695, %v3390_v42 }
 0x3f6   : > { %2410 = vrcp.f32 %v1856_v0  ;;  %v1855_v7 = vadd.f32 1.0, %v2401_v18 }
 0x3f7   : > { %2412 = vpow2.f32 %v2118_v19 }
 0x3f8   : > { %2414 = vrcp.f32 %v1855_v7  ;;  %v2302_v10 = vpop.f32.mrf.mxu1 }
 0x3f9   : > { %2416 = vpow2.f32 %v2117_v45  ;;  %v3394_v53 = vadd.f32 %v2302_v10, %v3359_v36 }
 0x3fa   : > { %v2403_v37 = vpop.eup %2402  ;;  %v1766_v55 = vpop.f32.mrf.mxu1 }
 0x3fb   : > { %v2405_v16 = vpop.eup %2404  ;;  %v2120_v32 = vmul.f32 -1.442695, %v3394_v53  ;;  %v3398_v2 = vadd.f32 %v1766_v55, %v3359_v36  ;;  %1919 = vrot.lane.b32.xlu0 %v2403_v37, %s2468_s7 }
 0x3fc   : > { %v2407_v22 = vpop.eup %2406  ;;  %v1858_v57 = vadd.f32 1.0, %v2405_v16 }
 0x3fd   : > { %v2409_v23 = vpop.eup %2408  ;;  %2418 = vpow2.f32 %v2120_v32  ;;  %v2119_v49 = vmul.f32 -1.442695, %v3398_v2  ;;  %1917 = vrot.lane.b32.xlu1 %v2407_v22, %s2468_s7 }
 0x3fe   : > { %2420 = vrcp.f32 %v1858_v57  ;;  %v1857_v34 = vadd.f32 1.0, %v2409_v23 }
 0x3ff   : > { %2422 = vpow2.f32 %v2119_v49 }
 0x400   : > { %2424 = vrcp.f32 %v1857_v34  ;;  %v2305_v3 = vpop.f32.mrf.mxu1 }
 0x401   : > { %v3404_v14 = vadd.f32 %v2305_v3, %v3359_v36 }
 0x402   : > { %v1776_v60 = vpop.f32.mrf.mxu1 }
 0x403   : > { %v2411_v11 = vpop.eup %2410  ;;  %v2122_v33 = vmul.f32 -1.442695, %v3404_v14  ;;  %v3408_v35 = vadd.f32 %v1776_v60, %v3359_v36 }
 0x404   : > { %v2413_v30 = vpop.eup %2412  ;;  %1923 = vrot.lane.b32.xlu0 %v2411_v11, %s2468_s7 }
 0x405   : > { %v2415_v48 = vpop.eup %2414  ;;  %v1860_v40 = vadd.f32 1.0, %v2413_v30  ;;  %2426 = vpow2.f32 %v2122_v33  ;;  %v2121_v28 = vmul.f32 -1.442695, %v3408_v35 }
 0x406   : > { %v2417_v44 = vpop.eup %2416  ;;  %1921 = vrot.lane.b32.xlu1 %v2415_v48, %s2468_s7 }
 0x407   : > { %2428 = vrcp.f32 %v1860_v40  ;;  %v1859_v25 = vadd.f32 1.0, %v2417_v44 }
 0x408   : > { %2430 = vpow2.f32 %v2121_v28  ;;  %v2308_v54 = vpop.f32.mrf.mxu1 }
 0x409   : > { %2432 = vrcp.f32 %v1859_v25  ;;  %v3414_v39 = vadd.f32 %v2308_v54, %v3359_v36 }
 0x40a   : > { %v2419_v6 = vpop.eup %2418  ;;  %v1786_v24 = vpop.f32.mrf.mxu1 }
 0x40b   : > { %v2421_v51 = vpop.eup %2420  ;;  %v1862_v59 = vadd.f32 1.0, %v2419_v6  ;;  %v2124_v8 = vmul.f32 -1.442695, %v3414_v39  ;;  %v3418_v47 = vadd.f32 %v1786_v24, %v3359_v36 }
 0x40c   : > { %v2423_v13 = vpop.eup %2422  ;;  %1927 = vrot.lane.b32.xlu0 %v2421_v51, %s2468_s7 }
 0x40d   : > { %v2425_v31 = vpop.eup %2424  ;;  %2434 = vrcp.f32 %v1862_v59  ;;  %v1861_v58 = vadd.f32 1.0, %v2423_v13  ;;  %v2123_v21 = vmul.f32 -1.442695, %v3418_v47 }
 0x40e   : > { %2436 = vpow2.f32 %v2124_v8  ;;  %1925 = vrot.lane.b32.xlu1 %v2425_v31, %s2468_s7 }
 0x40f   : > { %2438 = vrcp.f32 %v1861_v58 }
 0x410   : > { %2440 = vpow2.f32 %v2123_v21  ;;  %v2311_v46 = vpop.f32.mrf.mxu1 }
 0x411   : > { %v3424_v43 = vadd.f32 %v2311_v46, %v3359_v36 }
 0x412   : > { %v2427_v29 = vpop.eup %2426  ;;  %v1796_v5 = vpop.f32.mrf.mxu1 }
 0x413   : > { %v1864_v61 = vadd.f32 1.0, %v2427_v29  ;;  %v2126_v52 = vmul.f32 -1.442695, %v3424_v43  ;;  %v3428_v50 = vadd.f32 %v1796_v5, %v3359_v36 }
 0x414   : > { %v2429_v56 = vpop.eup %2428 }
 0x415   : > { %v2431_v20 = vpop.eup %2430  ;;  %1931 = vrot.lane.b32.xlu0 %v2429_v56, %s2468_s7  ;;  %2442 = vrcp.f32 %v1864_v61  ;;  %v2125_v1 = vmul.f32 -1.442695, %v3428_v50 }
 0x416   : > { %v2433_v26 = vpop.eup %2432  ;;  %v1863_v63 = vadd.f32 1.0, %v2431_v20  ;;  %2444 = vpow2.f32 %v2126_v52 }
 0x417   : > { %1929 = vrot.lane.b32.xlu1 %v2433_v26, %s2468_s7 }
 0x418   : > { %2446 = vrcp.f32 %v1863_v63 }
 0x419   : > { %2448 = vpow2.f32 %v2125_v1 }
 0x41a   : > { %v2435_v38 = vpop.eup %2434 }
 0x41b   : > { %v2437_v9 = vpop.eup %2436  ;;  %1935 = vrot.lane.b32.xlu0 %v2435_v38, %s2468_s7 }
 0x41c   : > { %v2439_v0 = vpop.eup %2438  ;;  %v1866_v36 = vadd.f32 1.0, %v2437_v9 }
 0x41d   : > { %v2441_v19 = vpop.eup %2440  ;;  %1933 = vrot.lane.b32.xlu1 %v2439_v0, %s2468_s7 }
 0x41e   : > { %2450 = vrcp.f32 %v1866_v36  ;;  %v1865_v18 = vadd.f32 1.0, %v2441_v19 }
 0x420   : > { %2452 = vrcp.f32 %v1865_v18 }
 0x422   : > { %v2443_v7 = vpop.eup %2442 }
 0x423   : > { %v2445_v45 = vpop.eup %2444  ;;  %1939 = vrot.lane.b32.xlu0 %v2443_v7, %s2468_s7 }
 0x424   : > { %v1868_v37 = vadd.f32 1.0, %v2445_v45 }
 0x425   : > { %v2447_v10 = vpop.eup %2446 }
 0x426   : > { %v2449_v55 = vpop.eup %2448  ;;  %1937 = vrot.lane.b32.xlu1 %v2447_v10, %s2468_s7  ;;  %2454 = vrcp.f32 %v1868_v37 }
 0x427   : > { %v1867_v16 = vadd.f32 1.0, %v2449_v55 }
 0x429   : > { %2456 = vrcp.f32 %v1867_v16 }
 0x42b   : > { %v2451_v32 = vpop.eup %2450 }
 0x42c   : > { %1943 = vrot.lane.b32.xlu0 %v2451_v32, %s2468_s7 }
 0x42d   : > { %v2453_v22 = vpop.eup %2452 }
 0x42e   : > { %1941 = vrot.lane.b32.xlu1 %v2453_v22, %s2468_s7 }
 0x433   : > { %v2455_v57 = vpop.eup %2454 }
 0x434   : > { %1947 = vrot.lane.b32.xlu0 %v2455_v57, %s2468_s7 }
 0x436   : > { %v2457_v23 = vpop.eup %2456 }
 0x437   : > { %1945 = vrot.lane.b32.xlu1 %v2457_v23, %s2468_s7 }
 0x46d   : > { %v1920_v49 = vpop.permute.xlu0 %1919 }
 0x46e   : > { %v1966_v34 = vmul.f32 %v1920_v49, %v3362_v12 }
 0x46f   : > { %v1918_v3 = vpop.permute.xlu1 %1917 }
 0x470   : > { %1982 = vst.msk [vmem:[%s3446_s30 + $0x8] sm:$0xff] %vm540_vm2, %v1966_v34  ;;  %v1965_v11 = vmul.f32 %v1918_v3, %v3366_v62 }
 0x472   : > { %1981 = vst.msk [vmem:[%s3446_s30] sm:$0xff] %vm540_vm2, %v1965_v11 }
 0x476   : > { %v1924_v60 = vpop.permute.xlu0 %1923 }
 0x477   : > { %v1968_v30 = vmul.f32 %v1924_v60, %v3370_v4 }
 0x478   : > { %v1922_v33 = vpop.permute.xlu1 %1921 }
 0x479   : > { %1984 = vst.msk [vmem:[%s3446_s30 + $0x18] sm:$0xff] %vm540_vm2, %v1968_v30  ;;  %v1967_v48 = vmul.f32 %v1922_v33, %v3374_v15 }
 0x47b   : > { %1983 = vst.msk [vmem:[%s3446_s30 + $0x10] sm:$0xff] %vm540_vm2, %v1967_v48 }
 0x47e   : > { %v1928_v12 = vpop.permute.xlu0 %1927 }
 0x47f   : > { %v1970_v40 = vmul.f32 %v1928_v12, %v3378_v17 }
 0x480   : > { %v1926_v62 = vpop.permute.xlu1 %1925 }
 0x481   : > { %1986 = vst.msk [vmem:[%s3446_s30 + $0x28] sm:$0xff] %vm540_vm2, %v1970_v40  ;;  %v1969_v44 = vmul.f32 %v1926_v62, %v3382_v27 }
 0x483   : > { %1985 = vst.msk [vmem:[%s3446_s30 + $0x20] sm:$0xff] %vm540_vm2, %v1969_v44 }
 0x487   : > { %v1932_v4 = vpop.permute.xlu0 %1931 }
 0x488   : > { %v1972_v28 = vmul.f32 %v1932_v4, %v3386_v41 }
 0x489   : > { %v1930_v15 = vpop.permute.xlu1 %1929 }
 0x48a   : > { %1988 = vst.msk [vmem:[%s3446_s30 + $0x38] sm:$0xff] %vm540_vm2, %v1972_v28  ;;  %v1971_v25 = vmul.f32 %v1930_v15, %v3390_v42 }
 0x48c   : > { %1987 = vst.msk [vmem:[%s3446_s30 + $0x30] sm:$0xff] %vm540_vm2, %v1971_v25 }
 0x48d   : > { %v1936_v17 = vpop.permute.xlu0 %1935 }
 0x48e   : > { %v1974_v54 = vmul.f32 %v1936_v17, %v3394_v53 }
 0x48f   : > { %v1934_v27 = vpop.permute.xlu1 %1933 }
 0x490   : > { %1990 = vst.msk [vmem:[%s3446_s30 + $0x48] sm:$0xff] %vm540_vm2, %v1974_v54  ;;  %v1973_v6 = vmul.f32 %v1934_v27, %v3398_v2 }
 0x492   : > { %1989 = vst.msk [vmem:[%s3446_s30 + $0x40] sm:$0xff] %vm540_vm2, %v1973_v6 }
 0x495   : > { %v1940_v41 = vpop.permute.xlu0 %1939 }
 0x496   : > { %v1976_v24 = vmul.f32 %v1940_v41, %v3404_v14 }
 0x498   : > { %v1938_v42 = vpop.permute.xlu1 %1937  ;;  %1992 = vst.msk [vmem:[%s3446_s30 + $0x58] sm:$0xff] %vm540_vm2, %v1976_v24 }
 0x499   : > { %v1975_v51 = vmul.f32 %v1938_v42, %v3408_v35 }
 0x49b   : > { %1991 = vst.msk [vmem:[%s3446_s30 + $0x50] sm:$0xff] %vm540_vm2, %v1975_v51 }
 0x49e   : > { %v1944_v53 = vpop.permute.xlu0 %1943 }
 0x49f   : > { %v1978_v59 = vmul.f32 %v1944_v53, %v3414_v39 }
 0x4a0   : > { %v1942_v8 = vpop.permute.xlu1 %1941 }
 0x4a1   : > { %1994 = vst.msk [vmem:[%s3446_s30 + $0x68] sm:$0xff] %vm540_vm2, %v1978_v59  ;;  %v1977_v2 = vmul.f32 %v1942_v8, %v3418_v47 }
 0x4a3   : > { %1993 = vst.msk [vmem:[%s3446_s30 + $0x60] sm:$0xff] %vm540_vm2, %v1977_v2 }
 0x4a6   : > { %v1948_v13 = vpop.permute.xlu0 %1947 }
 0x4a7   : > { %v1980_v14 = vmul.f32 %v1948_v13, %v3424_v43 }
 0x4a9   : > { %v1946_v31 = vpop.permute.xlu1 %1945  ;;  %1996 = vst.msk [vmem:[%s3446_s30 + $0x78] sm:$0xff] %vm540_vm2, %v1980_v14 }
 0x4aa   : > { %v1979_v35 = vmul.f32 %v1946_v31, %v3428_v50 }
 0x4ac   : > { %1995 = vst.msk [vmem:[%s3446_s30 + $0x70] sm:$0xff] %vm540_vm2, %v1979_v35 }
 0x4ad PF: > { %s15_s18 = sadd.s32 1, %s2465_s18  }
 0x4ae   : > { %p12_p4 = scmp.ge.s32.totalorder %s15_s18, 4  }
 0x4b0   :  { %14 = sbr.rel (!%p12_p4) target bundleno = 1 (0x1), region = 70 }

</bundles_post_ra>
